<compile_context>
chip_gen: v7x
topology: tpu7x:2x2x1
jax: 0.10.0
libtpu: 0.0.40
codegen_flags: <defaults>
</compile_context>

<pallas_src>
import functools

import jax
import jax.numpy as jnp
from jax import lax
from jax.experimental import pallas as pl
from jax.experimental.pallas import tpu as pltpu

H = 13            # nn.LSTM(input_size=1, hidden_size=13, num_layers=1)
HP = 128          # lane-padded hidden size (each gate / state row = exactly one vreg)
GATES = 4
GP = GATES * HP   # 512: lane-aligned gate row [ i | f | g | o ], 128 lanes per gate
GROUP = 8         # hidden-state rows flushed per aligned (8, 128) store


def _deepar_kernel(xb_ref, whh_ref, wmu_ref, bmu_ref, mu_ref, hs_ref, hbuf_ref,
                   *, num_groups, unroll):
    """Full DeepAR forward in a single invocation.

    xb_ref  : (T_pad, GP) VMEM — precomputed x_t * W_ih^T + (b_ih + b_hh), lane-padded
    whh_ref : (HP, GP)    VMEM — W_hh^T, zero-padded rows (13..127) and gate lanes
    wmu_ref : (HP, PP)    VMEM — distribution_mu weight^T, zero-padded
    bmu_ref : (1, PP)     VMEM — distribution_mu bias, zero-padded
    mu_ref  : (T_pad, PP) VMEM output
    hs_ref  : (T_pad, HP) VMEM scratch — per-step hidden state of the tracked column
    hbuf_ref: (GROUP, HP) VMEM scratch — row buffer for batched aligned hs stores
    """
    whh = whh_ref[...]                                   # hoisted out of the loop

    def group_step(gi, carry):
        h, c = carry                                     # (1, HP); padded lanes stay 0
        base = pl.multiple_of(gi * GROUP, GROUP)
        for j in range(GROUP):                           # static unroll within the group
            # Hoisted input+bias row: off the h-dependency chain, pipelines ahead.
            xb_t = xb_ref[pl.ds(base + j, 1), :]                        # (1, GP)
            gates = xb_t + jnp.dot(h, whh, preferred_element_type=jnp.float32)
            # 128-lane-aligned gate blocks: each slice is a pure vreg selection.
            i = jax.nn.sigmoid(gates[:, 0 * HP:1 * HP])
            f = jax.nn.sigmoid(gates[:, 1 * HP:2 * HP])
            g = jnp.tanh(gates[:, 2 * HP:3 * HP])
            o = jax.nn.sigmoid(gates[:, 3 * HP:4 * HP])
            c = f * c + i * g
            h = o * jnp.tanh(c)
            hbuf_ref[pl.ds(j, 1), :] = h                 # static-offset row write
        # One aligned, unmasked (8, 128) store per group instead of 8 dynamic
        # single-row masked stores.
        hs_ref[pl.ds(base, GROUP), :] = hbuf_ref[...]
        return h, c

    h0 = jnp.zeros((1, HP), jnp.float32)
    c0 = jnp.zeros((1, HP), jnp.float32)
    lax.fori_loop(0, num_groups, group_step, (h0, c0), unroll=unroll)

    # Batched mu head: one (T_pad, HP) @ (HP, PP) matmul + bias, full-lane store.
    mu_ref[...] = (jnp.dot(hs_ref[...], wmu_ref[...],
                           preferred_element_type=jnp.float32)
                   + bmu_ref[...])


def prepare_params(params):
    """One-time weight massaging into lane-aligned, zero-padded kernel operands.

    Zero padding of W_hh rows / gate lanes and of W_mu rows is what keeps the padded
    lanes of h and c at exactly 0 throughout the recurrence (sigmoid(0)=0.5 never
    leaks into the real 13 lanes because the corresponding weight rows are zero).
    """
    f32 = jnp.float32
    P = params["w_mu"].shape[0]
    PP = -(-P // 128) * 128                              # lane-padded pred_len

    w_ih = params["w_ih"].astype(f32).reshape(GATES, H)                 # (4, 13)
    wih_pad = jnp.zeros((GATES, HP), f32).at[:, :H].set(w_ih).reshape(1, GP)

    bias = (params["b_ih"] + params["b_hh"]).astype(f32).reshape(GATES, H)
    b_pad = jnp.zeros((GATES, HP), f32).at[:, :H].set(bias).reshape(1, GP)

    w_hh = params["w_hh"].astype(f32).reshape(GATES, H, H)              # (gate, out_j, in_h)
    whh_t = jnp.transpose(w_hh, (2, 0, 1))                              # (in_h, gate, out_j)
    whh_pad = (jnp.zeros((HP, GATES, HP), f32)
               .at[:H, :, :H].set(whh_t).reshape(HP, GP))

    wmu_pad = jnp.zeros((HP, PP), f32).at[:H, :P].set(params["w_mu"].astype(f32).T)
    bmu_pad = jnp.zeros((1, PP), f32).at[0, :P].set(params["b_mu"].astype(f32))

    return dict(wih_pad=wih_pad, b_pad=b_pad, whh_pad=whh_pad,
                wmu_pad=wmu_pad, bmu_pad=bmu_pad, pred_len=P)


def deepar_forward(x_enc, x_mark_enc, x_dec, x_mark_dec, prepared,
                   enc_self_mask=None, dec_self_mask=None, dec_enc_mask=None):
    """Equivalent of Model.forward; only x_enc is actually used."""
    del x_mark_enc, x_dec, x_mark_dec, enc_self_mask, dec_self_mask, dec_enc_mask
    T, L, _ = x_enc.shape
    P = prepared["pred_len"]
    PP = prepared["wmu_pad"].shape[1]
    T_pad = -(-T // GROUP) * GROUP
    num_groups = T_pad // GROUP

    # Only LSTM-batch column L-1 ever reaches the output head; exact pruning.
    x_col = x_enc[:, L - 1, 0].astype(jnp.float32)                      # (T,)
    # Hoisted input+bias contribution: one (1, GP) row per time step.
    xb = x_col[:, None] * prepared["wih_pad"] + prepared["b_pad"]       # (T, GP)
    if T_pad != T:
        xb = jnp.pad(xb, ((0, T_pad - T), (0, 0)))                      # bogus tail steps, discarded

    # Full unroll up to 128 steps (16 groups of 8); 32 steps per body beyond that.
    unroll = True if num_groups <= 16 else 4

    kernel = functools.partial(_deepar_kernel, num_groups=num_groups, unroll=unroll)
    vmem = pl.BlockSpec(memory_space=pltpu.MemorySpace.VMEM)

    mu_pad = pl.pallas_call(
        kernel,
        out_shape=jax.ShapeDtypeStruct((T_pad, PP), jnp.float32),
        in_specs=[vmem, vmem, vmem, vmem],
        out_specs=vmem,
        scratch_shapes=[pltpu.VMEM((T_pad, HP), jnp.float32),   # per-step hidden states
                        pltpu.VMEM((GROUP, HP), jnp.float32)],  # group row buffer
    )(xb, prepared["whh_pad"], prepared["wmu_pad"], prepared["bmu_pad"])

    # mu.unsqueeze(dim=-1): (T, P, 1)
    return mu_pad[:T, :P][..., None]


def init_params(key, pred_len):
    """Deterministic PyTorch-style uniform(-1/sqrt(H), 1/sqrt(H)) init."""
    k = float(1.0 / (H ** 0.5))
    ks = jax.random.split(key, 6)
    u = lambda kk, shape: jax.random.uniform(kk, shape, jnp.float32, -k, k)
    # TODO(synk): self.lstmfc (Linear 13->pred_len), self.fc (Conv1d 96->pred_len) and
    # the presigma/Softplus head exist in __init__/forward but never reach the returned
    # value, so they are not materialized here.
    return dict(
        w_ih=u(ks[0], (4 * H, 1)),
        w_hh=u(ks[1], (4 * H, H)),
        b_ih=u(ks[2], (4 * H,)),
        b_hh=u(ks[3], (4 * H,)),
        w_mu=u(ks[4], (pred_len, H)),
        b_mu=u(ks[5], (pred_len,)),
    )


def deepar_ref(x_enc, params):
    """Pure-JAX reference of the same forward pass (full-batch lax.scan LSTM)."""
    wih_t = params["w_ih"].T
    whh_t = params["w_hh"].T
    b = params["b_ih"] + params["b_hh"]

    def step(carry, x_t):
        h, c = carry
        gates = x_t @ wih_t + h @ whh_t + b
        i = jax.nn.sigmoid(gates[:, 0 * H:1 * H])
        f = jax.nn.sigmoid(gates[:, 1 * H:2 * H])
        g = jnp.tanh(gates[:, 2 * H:3 * H])
        o = jax.nn.sigmoid(gates[:, 3 * H:4 * H])
        c = f * c + i * g
        h = o * jnp.tanh(c)
        return (h, c), h

    T, B, _ = x_enc.shape
    h0 = jnp.zeros((B, H), jnp.float32)
    c0 = jnp.zeros((B, H), jnp.float32)
    _, hs = lax.scan(step, (h0, c0), x_enc)      # hs: (T, B, H)
    lstm_out = hs[:, -1, :]                      # (T, H)
    mu = lstm_out @ params["w_mu"].T + params["b_mu"]
    return mu[..., None]                         # (T, P, 1)


if __name__ == "__main__":
    key = jax.random.PRNGKey(0)
    k_x, k_p = jax.random.split(key)

    pred_len = 8
    T, L = 4, 16                                   # x_enc "[batch, seq, 1]"
    x_enc = jax.random.normal(k_x, (T, L, 1), jnp.float32)
    x_mark_enc = jnp.zeros((T, L, 4), jnp.float32)
    x_dec = jnp.zeros((T, L // 2 + pred_len, 1), jnp.float32)
    x_mark_dec = jnp.zeros((T, L // 2 + pred_len, 4), jnp.float32)

    params = init_params(k_p, pred_len)
    prepared = prepare_params(params)              # one-time weight massaging

    out = deepar_forward(x_enc, x_mark_enc, x_dec, x_mark_dec, prepared)
    out = jax.block_until_ready(out)

    ref = deepar_ref(x_enc, params)
    assert out.shape == (T, pred_len, 1), out.shape
    if not jnp.allclose(out, ref, atol=1e-3, rtol=1e-3):
        raise AssertionError("Pallas kernel output does not match JAX reference")

    print("KERNEL_OK")
</pallas_src>

<mosaic_0001>
module attributes {stable_mosaic.version = 11 : i64} {
  func.func @_deepar_kernel(%arg0: memref<8x512xf32, #tpu.memory_space<vmem>>, %arg1: memref<128x512xf32, #tpu.memory_space<vmem>>, %arg2: memref<128x128xf32, #tpu.memory_space<vmem>>, %arg3: memref<1x128xf32, #tpu.memory_space<vmem>>, %arg4: memref<8x128xf32, #tpu.memory_space<vmem>>, %arg5: memref<8x128xf32, #tpu.memory_space<vmem>>, %arg6: memref<8x128xf32, #tpu.memory_space<vmem>>) attributes {dimension_semantics = [], scalar_prefetch = 0 : i64, scratch_operands = 2 : i64, tpu.core_type = #tpu.core_type<tc>} {
    %c0 = arith.constant 0 : index
    %c0_0 = arith.constant 0 : index
    %0 = vector.load %arg1[%c0, %c0_0] : memref<128x512xf32, #tpu.memory_space<vmem>>, vector<128x512xf32>
    %cst = arith.constant 0.000000e+00 : f32
    %1 = vector.broadcast %cst : f32 to vector<1x128xf32>
    %cst_1 = arith.constant 0.000000e+00 : f32
    %2 = vector.broadcast %cst_1 : f32 to vector<1x128xf32>
    %c0_i32 = arith.constant 0 : i32
    %c8_i32 = arith.constant 8 : i32
    %3 = arith.muli %c0_i32, %c8_i32 : i32
    %4 = tpu.assume_multiple %3, 8 : i32
    %c0_i32_2 = arith.constant 0 : i32
    %5 = arith.addi %4, %c0_i32_2 : i32
    %6 = arith.index_cast %5 : i32 to index
    %c0_3 = arith.constant 0 : index
    %7 = vector.load %arg0[%6, %c0_3] : memref<8x512xf32, #tpu.memory_space<vmem>>, vector<1x512xf32>
    %cst_4 = arith.constant dense<0.000000e+00> : vector<1x512xf32>
    %8 = tpu.matmul %1, %0, %cst_4 {dimension_numbers = #tpu.dot_dimension_numbers<[1], [0], [0], [1], [0, 0, 1, 1], [], []>} : vector<1x128xf32>, vector<128x512xf32>, vector<1x512xf32> -> vector<1x512xf32>
    %9 = arith.addf %7, %8 : vector<1x512xf32>
    %10 = vector.extract_strided_slice %9 {offsets = [0, 0], sizes = [1, 128], strides = [1, 1]} : vector<1x512xf32> to vector<1x128xf32>
    %11 = arith.negf %10 : vector<1x128xf32>
    %12 = math.exp %11 : vector<1x128xf32>
    %cst_5 = arith.constant 1.000000e+00 : f32
    %13 = vector.broadcast %cst_5 : f32 to vector<1x128xf32>
    %14 = arith.addf %13, %12 : vector<1x128xf32>
    %15 = arith.divf %13, %14 : vector<1x128xf32>
    %16 = vector.extract_strided_slice %9 {offsets = [0, 128], sizes = [1, 128], strides = [1, 1]} : vector<1x512xf32> to vector<1x128xf32>
    %17 = arith.negf %16 : vector<1x128xf32>
    %18 = math.exp %17 : vector<1x128xf32>
    %cst_6 = arith.constant 1.000000e+00 : f32
    %19 = vector.broadcast %cst_6 : f32 to vector<1x128xf32>
    %20 = arith.addf %19, %18 : vector<1x128xf32>
    %21 = arith.divf %19, %20 : vector<1x128xf32>
    %22 = vector.extract_strided_slice %9 {offsets = [0, 256], sizes = [1, 128], strides = [1, 1]} : vector<1x512xf32> to vector<1x128xf32>
    %23 = math.tanh %22 : vector<1x128xf32>
    %24 = vector.extract_strided_slice %9 {offsets = [0, 384], sizes = [1, 128], strides = [1, 1]} : vector<1x512xf32> to vector<1x128xf32>
    %25 = arith.negf %24 : vector<1x128xf32>
    %26 = math.exp %25 : vector<1x128xf32>
    %cst_7 = arith.constant 1.000000e+00 : f32
    %27 = vector.broadcast %cst_7 : f32 to vector<1x128xf32>
    %28 = arith.addf %27, %26 : vector<1x128xf32>
    %29 = arith.divf %27, %28 : vector<1x128xf32>
    %30 = arith.mulf %21, %2 : vector<1x128xf32>
    %31 = arith.mulf %15, %23 : vector<1x128xf32>
    %32 = arith.addf %30, %31 : vector<1x128xf32>
    %33 = math.tanh %32 : vector<1x128xf32>
    %34 = arith.mulf %29, %33 : vector<1x128xf32>
    %c0_8 = arith.constant 0 : index
    %c0_9 = arith.constant 0 : index
    %35 = vector.load %arg6[%c0_8, %c0_9] : memref<8x128xf32, #tpu.memory_space<vmem>>, vector<1x128xf32>
    tpu.vector_store %arg6[%c0_8, %c0_9], %34 {strides = array<i32>} : memref<8x128xf32, #tpu.memory_space<vmem>>, vector<1x128xf32>,
    %c1_i32 = arith.constant 1 : i32
    %36 = arith.addi %4, %c1_i32 : i32
    %37 = arith.index_cast %36 : i32 to index
    %c0_10 = arith.constant 0 : index
    %38 = vector.load %arg0[%37, %c0_10] : memref<8x512xf32, #tpu.memory_space<vmem>>, vector<1x512xf32>
    %cst_11 = arith.constant dense<0.000000e+00> : vector<1x512xf32>
    %39 = tpu.matmul %34, %0, %cst_11 {dimension_numbers = #tpu.dot_dimension_numbers<[1], [0], [0], [1], [0, 0, 1, 1], [], []>} : vector<1x128xf32>, vector<128x512xf32>, vector<1x512xf32> -> vector<1x512xf32>
    %40 = arith.addf %38, %39 : vector<1x512xf32>
    %41 = vector.extract_strided_slice %40 {offsets = [0, 0], sizes = [1, 128], strides = [1, 1]} : vector<1x512xf32> to vector<1x128xf32>
    %42 = arith.negf %41 : vector<1x128xf32>
    %43 = math.exp %42 : vector<1x128xf32>
    %cst_12 = arith.constant 1.000000e+00 : f32
    %44 = vector.broadcast %cst_12 : f32 to vector<1x128xf32>
    %45 = arith.addf %44, %43 : vector<1x128xf32>
    %46 = arith.divf %44, %45 : vector<1x128xf32>
    %47 = vector.extract_strided_slice %40 {offsets = [0, 128], sizes = [1, 128], strides = [1, 1]} : vector<1x512xf32> to vector<1x128xf32>
    %48 = arith.negf %47 : vector<1x128xf32>
    %49 = math.exp %48 : vector<1x128xf32>
    %cst_13 = arith.constant 1.000000e+00 : f32
    %50 = vector.broadcast %cst_13 : f32 to vector<1x128xf32>
    %51 = arith.addf %50, %49 : vector<1x128xf32>
    %52 = arith.divf %50, %51 : vector<1x128xf32>
    %53 = vector.extract_strided_slice %40 {offsets = [0, 256], sizes = [1, 128], strides = [1, 1]} : vector<1x512xf32> to vector<1x128xf32>
    %54 = math.tanh %53 : vector<1x128xf32>
    %55 = vector.extract_strided_slice %40 {offsets = [0, 384], sizes = [1, 128], strides = [1, 1]} : vector<1x512xf32> to vector<1x128xf32>
    %56 = arith.negf %55 : vector<1x128xf32>
    %57 = math.exp %56 : vector<1x128xf32>
    %cst_14 = arith.constant 1.000000e+00 : f32
    %58 = vector.broadcast %cst_14 : f32 to vector<1x128xf32>
    %59 = arith.addf %58, %57 : vector<1x128xf32>
    %60 = arith.divf %58, %59 : vector<1x128xf32>
    %61 = arith.mulf %52, %32 : vector<1x128xf32>
    %62 = arith.mulf %46, %54 : vector<1x128xf32>
    %63 = arith.addf %61, %62 : vector<1x128xf32>
    %64 = math.tanh %63 : vector<1x128xf32>
    %65 = arith.mulf %60, %64 : vector<1x128xf32>
    %c1 = arith.constant 1 : index
    %c0_15 = arith.constant 0 : index
    %66 = vector.load %arg6[%c1, %c0_15] : memref<8x128xf32, #tpu.memory_space<vmem>>, vector<1x128xf32>
    tpu.vector_store %arg6[%c1, %c0_15], %65 {strides = array<i32>} : memref<8x128xf32, #tpu.memory_space<vmem>>, vector<1x128xf32>,
    %c2_i32 = arith.constant 2 : i32
    %67 = arith.addi %4, %c2_i32 : i32
    %68 = arith.index_cast %67 : i32 to index
    %c0_16 = arith.constant 0 : index
    %69 = vector.load %arg0[%68, %c0_16] : memref<8x512xf32, #tpu.memory_space<vmem>>, vector<1x512xf32>
    %cst_17 = arith.constant dense<0.000000e+00> : vector<1x512xf32>
    %70 = tpu.matmul %65, %0, %cst_17 {dimension_numbers = #tpu.dot_dimension_numbers<[1], [0], [0], [1], [0, 0, 1, 1], [], []>} : vector<1x128xf32>, vector<128x512xf32>, vector<1x512xf32> -> vector<1x512xf32>
    %71 = arith.addf %69, %70 : vector<1x512xf32>
    %72 = vector.extract_strided_slice %71 {offsets = [0, 0], sizes = [1, 128], strides = [1, 1]} : vector<1x512xf32> to vector<1x128xf32>
    %73 = arith.negf %72 : vector<1x128xf32>
    %74 = math.exp %73 : vector<1x128xf32>
    %cst_18 = arith.constant 1.000000e+00 : f32
    %75 = vector.broadcast %cst_18 : f32 to vector<1x128xf32>
    %76 = arith.addf %75, %74 : vector<1x128xf32>
    %77 = arith.divf %75, %76 : vector<1x128xf32>
    %78 = vector.extract_strided_slice %71 {offsets = [0, 128], sizes = [1, 128], strides = [1, 1]} : vector<1x512xf32> to vector<1x128xf32>
    %79 = arith.negf %78 : vector<1x128xf32>
    %80 = math.exp %79 : vector<1x128xf32>
    %cst_19 = arith.constant 1.000000e+00 : f32
    %81 = vector.broadcast %cst_19 : f32 to vector<1x128xf32>
    %82 = arith.addf %81, %80 : vector<1x128xf32>
    %83 = arith.divf %81, %82 : vector<1x128xf32>
    %84 = vector.extract_strided_slice %71 {offsets = [0, 256], sizes = [1, 128], strides = [1, 1]} : vector<1x512xf32> to vector<1x128xf32>
    %85 = math.tanh %84 : vector<1x128xf32>
    %86 = vector.extract_strided_slice %71 {offsets = [0, 384], sizes = [1, 128], strides = [1, 1]} : vector<1x512xf32> to vector<1x128xf32>
    %87 = arith.negf %86 : vector<1x128xf32>
    %88 = math.exp %87 : vector<1x128xf32>
    %cst_20 = arith.constant 1.000000e+00 : f32
    %89 = vector.broadcast %cst_20 : f32 to vector<1x128xf32>
    %90 = arith.addf %89, %88 : vector<1x128xf32>
    %91 = arith.divf %89, %90 : vector<1x128xf32>
    %92 = arith.mulf %83, %63 : vector<1x128xf32>
    %93 = arith.mulf %77, %85 : vector<1x128xf32>
    %94 = arith.addf %92, %93 : vector<1x128xf32>
    %95 = math.tanh %94 : vector<1x128xf32>
    %96 = arith.mulf %91, %95 : vector<1x128xf32>
    %c2 = arith.constant 2 : index
    %c0_21 = arith.constant 0 : index
    %97 = vector.load %arg6[%c2, %c0_21] : memref<8x128xf32, #tpu.memory_space<vmem>>, vector<1x128xf32>
    tpu.vector_store %arg6[%c2, %c0_21], %96 {strides = array<i32>} : memref<8x128xf32, #tpu.memory_space<vmem>>, vector<1x128xf32>,
    %c3_i32 = arith.constant 3 : i32
    %98 = arith.addi %4, %c3_i32 : i32
    %99 = arith.index_cast %98 : i32 to index
    %c0_22 = arith.constant 0 : index
    %100 = vector.load %arg0[%99, %c0_22] : memref<8x512xf32, #tpu.memory_space<vmem>>, vector<1x512xf32>
    %cst_23 = arith.constant dense<0.000000e+00> : vector<1x512xf32>
    %101 = tpu.matmul %96, %0, %cst_23 {dimension_numbers = #tpu.dot_dimension_numbers<[1], [0], [0], [1], [0, 0, 1, 1], [], []>} : vector<1x128xf32>, vector<128x512xf32>, vector<1x512xf32> -> vector<1x512xf32>
    %102 = arith.addf %100, %101 : vector<1x512xf32>
    %103 = vector.extract_strided_slice %102 {offsets = [0, 0], sizes = [1, 128], strides = [1, 1]} : vector<1x512xf32> to vector<1x128xf32>
    %104 = arith.negf %103 : vector<1x128xf32>
    %105 = math.exp %104 : vector<1x128xf32>
    %cst_24 = arith.constant 1.000000e+00 : f32
    %106 = vector.broadcast %cst_24 : f32 to vector<1x128xf32>
    %107 = arith.addf %106, %105 : vector<1x128xf32>
    %108 = arith.divf %106, %107 : vector<1x128xf32>
    %109 = vector.extract_strided_slice %102 {offsets = [0, 128], sizes = [1, 128], strides = [1, 1]} : vector<1x512xf32> to vector<1x128xf32>
    %110 = arith.negf %109 : vector<1x128xf32>
    %111 = math.exp %110 : vector<1x128xf32>
    %cst_25 = arith.constant 1.000000e+00 : f32
    %112 = vector.broadcast %cst_25 : f32 to vector<1x128xf32>
    %113 = arith.addf %112, %111 : vector<1x128xf32>
    %114 = arith.divf %112, %113 : vector<1x128xf32>
    %115 = vector.extract_strided_slice %102 {offsets = [0, 256], sizes = [1, 128], strides = [1, 1]} : vector<1x512xf32> to vector<1x128xf32>
    %116 = math.tanh %115 : vector<1x128xf32>
    %117 = vector.extract_strided_slice %102 {offsets = [0, 384], sizes = [1, 128], strides = [1, 1]} : vector<1x512xf32> to vector<1x128xf32>
    %118 = arith.negf %117 : vector<1x128xf32>
    %119 = math.exp %118 : vector<1x128xf32>
    %cst_26 = arith.constant 1.000000e+00 : f32
    %120 = vector.broadcast %cst_26 : f32 to vector<1x128xf32>
    %121 = arith.addf %120, %119 : vector<1x128xf32>
    %122 = arith.divf %120, %121 : vector<1x128xf32>
    %123 = arith.mulf %114, %94 : vector<1x128xf32>
    %124 = arith.mulf %108, %116 : vector<1x128xf32>
    %125 = arith.addf %123, %124 : vector<1x128xf32>
    %126 = math.tanh %125 : vector<1x128xf32>
    %127 = arith.mulf %122, %126 : vector<1x128xf32>
    %c3 = arith.constant 3 : index
    %c0_27 = arith.constant 0 : index
    %128 = vector.load %arg6[%c3, %c0_27] : memref<8x128xf32, #tpu.memory_space<vmem>>, vector<1x128xf32>
    tpu.vector_store %arg6[%c3, %c0_27], %127 {strides = array<i32>} : memref<8x128xf32, #tpu.memory_space<vmem>>, vector<1x128xf32>,
    %c4_i32 = arith.constant 4 : i32
    %129 = arith.addi %4, %c4_i32 : i32
    %130 = arith.index_cast %129 : i32 to index
    %c0_28 = arith.constant 0 : index
    %131 = vector.load %arg0[%130, %c0_28] : memref<8x512xf32, #tpu.memory_space<vmem>>, vector<1x512xf32>
    %cst_29 = arith.constant dense<0.000000e+00> : vector<1x512xf32>
    %132 = tpu.matmul %127, %0, %cst_29 {dimension_numbers = #tpu.dot_dimension_numbers<[1], [0], [0], [1], [0, 0, 1, 1], [], []>} : vector<1x128xf32>, vector<128x512xf32>, vector<1x512xf32> -> vector<1x512xf32>
    %133 = arith.addf %131, %132 : vector<1x512xf32>
    %134 = vector.extract_strided_slice %133 {offsets = [0, 0], sizes = [1, 128], strides = [1, 1]} : vector<1x512xf32> to vector<1x128xf32>
    %135 = arith.negf %134 : vector<1x128xf32>
    %136 = math.exp %135 : vector<1x128xf32>
    %cst_30 = arith.constant 1.000000e+00 : f32
    %137 = vector.broadcast %cst_30 : f32 to vector<1x128xf32>
    %138 = arith.addf %137, %136 : vector<1x128xf32>
    %139 = arith.divf %137, %138 : vector<1x128xf32>
    %140 = vector.extract_strided_slice %133 {offsets = [0, 128], sizes = [1, 128], strides = [1, 1]} : vector<1x512xf32> to vector<1x128xf32>
    %141 = arith.negf %140 : vector<1x128xf32>
    %142 = math.exp %141 : vector<1x128xf32>
    %cst_31 = arith.constant 1.000000e+00 : f32
    %143 = vector.broadcast %cst_31 : f32 to vector<1x128xf32>
    %144 = arith.addf %143, %142 : vector<1x128xf32>
    %145 = arith.divf %143, %144 : vector<1x128xf32>
    %146 = vector.extract_strided_slice %133 {offsets = [0, 256], sizes = [1, 128], strides = [1, 1]} : vector<1x512xf32> to vector<1x128xf32>
    %147 = math.tanh %146 : vector<1x128xf32>
    %148 = vector.extract_strided_slice %133 {offsets = [0, 384], sizes = [1, 128], strides = [1, 1]} : vector<1x512xf32> to vector<1x128xf32>
    %149 = arith.negf %148 : vector<1x128xf32>
    %150 = math.exp %149 : vector<1x128xf32>
    %cst_32 = arith.constant 1.000000e+00 : f32
    %151 = vector.broadcast %cst_32 : f32 to vector<1x128xf32>
    %152 = arith.addf %151, %150 : vector<1x128xf32>
    %153 = arith.divf %151, %152 : vector<1x128xf32>
    %154 = arith.mulf %145, %125 : vector<1x128xf32>
    %155 = arith.mulf %139, %147 : vector<1x128xf32>
    %156 = arith.addf %154, %155 : vector<1x128xf32>
    %157 = math.tanh %156 : vector<1x128xf32>
    %158 = arith.mulf %153, %157 : vector<1x128xf32>
    %c4 = arith.constant 4 : index
    %c0_33 = arith.constant 0 : index
    %159 = vector.load %arg6[%c4, %c0_33] : memref<8x128xf32, #tpu.memory_space<vmem>>, vector<1x128xf32>
    tpu.vector_store %arg6[%c4, %c0_33], %158 {strides = array<i32>} : memref<8x128xf32, #tpu.memory_space<vmem>>, vector<1x128xf32>,
    %c5_i32 = arith.constant 5 : i32
    %160 = arith.addi %4, %c5_i32 : i32
    %161 = arith.index_cast %160 : i32 to index
    %c0_34 = arith.constant 0 : index
    %162 = vector.load %arg0[%161, %c0_34] : memref<8x512xf32, #tpu.memory_space<vmem>>, vector<1x512xf32>
    %cst_35 = arith.constant dense<0.000000e+00> : vector<1x512xf32>
    %163 = tpu.matmul %158, %0, %cst_35 {dimension_numbers = #tpu.dot_dimension_numbers<[1], [0], [0], [1], [0, 0, 1, 1], [], []>} : vector<1x128xf32>, vector<128x512xf32>, vector<1x512xf32> -> vector<1x512xf32>
    %164 = arith.addf %162, %163 : vector<1x512xf32>
    %165 = vector.extract_strided_slice %164 {offsets = [0, 0], sizes = [1, 128], strides = [1, 1]} : vector<1x512xf32> to vector<1x128xf32>
    %166 = arith.negf %165 : vector<1x128xf32>
    %167 = math.exp %166 : vector<1x128xf32>
    %cst_36 = arith.constant 1.000000e+00 : f32
    %168 = vector.broadcast %cst_36 : f32 to vector<1x128xf32>
    %169 = arith.addf %168, %167 : vector<1x128xf32>
    %170 = arith.divf %168, %169 : vector<1x128xf32>
    %171 = vector.extract_strided_slice %164 {offsets = [0, 128], sizes = [1, 128], strides = [1, 1]} : vector<1x512xf32> to vector<1x128xf32>
    %172 = arith.negf %171 : vector<1x128xf32>
    %173 = math.exp %172 : vector<1x128xf32>
    %cst_37 = arith.constant 1.000000e+00 : f32
    %174 = vector.broadcast %cst_37 : f32 to vector<1x128xf32>
    %175 = arith.addf %174, %173 : vector<1x128xf32>
    %176 = arith.divf %174, %175 : vector<1x128xf32>
    %177 = vector.extract_strided_slice %164 {offsets = [0, 256], sizes = [1, 128], strides = [1, 1]} : vector<1x512xf32> to vector<1x128xf32>
    %178 = math.tanh %177 : vector<1x128xf32>
    %179 = vector.extract_strided_slice %164 {offsets = [0, 384], sizes = [1, 128], strides = [1, 1]} : vector<1x512xf32> to vector<1x128xf32>
    %180 = arith.negf %179 : vector<1x128xf32>
    %181 = math.exp %180 : vector<1x128xf32>
    %cst_38 = arith.constant 1.000000e+00 : f32
    %182 = vector.broadcast %cst_38 : f32 to vector<1x128xf32>
    %183 = arith.addf %182, %181 : vector<1x128xf32>
    %184 = arith.divf %182, %183 : vector<1x128xf32>
    %185 = arith.mulf %176, %156 : vector<1x128xf32>
    %186 = arith.mulf %170, %178 : vector<1x128xf32>
    %187 = arith.addf %185, %186 : vector<1x128xf32>
    %188 = math.tanh %187 : vector<1x128xf32>
    %189 = arith.mulf %184, %188 : vector<1x128xf32>
    %c5 = arith.constant 5 : index
    %c0_39 = arith.constant 0 : index
    %190 = vector.load %arg6[%c5, %c0_39] : memref<8x128xf32, #tpu.memory_space<vmem>>, vector<1x128xf32>
    tpu.vector_store %arg6[%c5, %c0_39], %189 {strides = array<i32>} : memref<8x128xf32, #tpu.memory_space<vmem>>, vector<1x128xf32>,
    %c6_i32 = arith.constant 6 : i32
    %191 = arith.addi %4, %c6_i32 : i32
    %192 = arith.index_cast %191 : i32 to index
    %c0_40 = arith.constant 0 : index
    %193 = vector.load %arg0[%192, %c0_40] : memref<8x512xf32, #tpu.memory_space<vmem>>, vector<1x512xf32>
    %cst_41 = arith.constant dense<0.000000e+00> : vector<1x512xf32>
    %194 = tpu.matmul %189, %0, %cst_41 {dimension_numbers = #tpu.dot_dimension_numbers<[1], [0], [0], [1], [0, 0, 1, 1], [], []>} : vector<1x128xf32>, vector<128x512xf32>, vector<1x512xf32> -> vector<1x512xf32>
    %195 = arith.addf %193, %194 : vector<1x512xf32>
    %196 = vector.extract_strided_slice %195 {offsets = [0, 0], sizes = [1, 128], strides = [1, 1]} : vector<1x512xf32> to vector<1x128xf32>
    %197 = arith.negf %196 : vector<1x128xf32>
    %198 = math.exp %197 : vector<1x128xf32>
    %cst_42 = arith.constant 1.000000e+00 : f32
    %199 = vector.broadcast %cst_42 : f32 to vector<1x128xf32>
    %200 = arith.addf %199, %198 : vector<1x128xf32>
    %201 = arith.divf %199, %200 : vector<1x128xf32>
    %202 = vector.extract_strided_slice %195 {offsets = [0, 128], sizes = [1, 128], strides = [1, 1]} : vector<1x512xf32> to vector<1x128xf32>
    %203 = arith.negf %202 : vector<1x128xf32>
    %204 = math.exp %203 : vector<1x128xf32>
    %cst_43 = arith.constant 1.000000e+00 : f32
    %205 = vector.broadcast %cst_43 : f32 to vector<1x128xf32>
    %206 = arith.addf %205, %204 : vector<1x128xf32>
    %207 = arith.divf %205, %206 : vector<1x128xf32>
    %208 = vector.extract_strided_slice %195 {offsets = [0, 256], sizes = [1, 128], strides = [1, 1]} : vector<1x512xf32> to vector<1x128xf32>
    %209 = math.tanh %208 : vector<1x128xf32>
    %210 = vector.extract_strided_slice %195 {offsets = [0, 384], sizes = [1, 128], strides = [1, 1]} : vector<1x512xf32> to vector<1x128xf32>
    %211 = arith.negf %210 : vector<1x128xf32>
    %212 = math.exp %211 : vector<1x128xf32>
    %cst_44 = arith.constant 1.000000e+00 : f32
    %213 = vector.broadcast %cst_44 : f32 to vector<1x128xf32>
    %214 = arith.addf %213, %212 : vector<1x128xf32>
    %215 = arith.divf %213, %214 : vector<1x128xf32>
    %216 = arith.mulf %207, %187 : vector<1x128xf32>
    %217 = arith.mulf %201, %209 : vector<1x128xf32>
    %218 = arith.addf %216, %217 : vector<1x128xf32>
    %219 = math.tanh %218 : vector<1x128xf32>
    %220 = arith.mulf %215, %219 : vector<1x128xf32>
    %c6 = arith.constant 6 : index
    %c0_45 = arith.constant 0 : index
    %221 = vector.load %arg6[%c6, %c0_45] : memref<8x128xf32, #tpu.memory_space<vmem>>, vector<1x128xf32>
    tpu.vector_store %arg6[%c6, %c0_45], %220 {strides = array<i32>} : memref<8x128xf32, #tpu.memory_space<vmem>>, vector<1x128xf32>,
    %c7_i32 = arith.constant 7 : i32
    %222 = arith.addi %4, %c7_i32 : i32
    %223 = arith.index_cast %222 : i32 to index
    %c0_46 = arith.constant 0 : index
    %224 = vector.load %arg0[%223, %c0_46] : memref<8x512xf32, #tpu.memory_space<vmem>>, vector<1x512xf32>
    %cst_47 = arith.constant dense<0.000000e+00> : vector<1x512xf32>
    %225 = tpu.matmul %220, %0, %cst_47 {dimension_numbers = #tpu.dot_dimension_numbers<[1], [0], [0], [1], [0, 0, 1, 1], [], []>} : vector<1x128xf32>, vector<128x512xf32>, vector<1x512xf32> -> vector<1x512xf32>
    %226 = arith.addf %224, %225 : vector<1x512xf32>
    %227 = vector.extract_strided_slice %226 {offsets = [0, 0], sizes = [1, 128], strides = [1, 1]} : vector<1x512xf32> to vector<1x128xf32>
    %228 = arith.negf %227 : vector<1x128xf32>
    %229 = math.exp %228 : vector<1x128xf32>
    %cst_48 = arith.constant 1.000000e+00 : f32
    %230 = vector.broadcast %cst_48 : f32 to vector<1x128xf32>
    %231 = arith.addf %230, %229 : vector<1x128xf32>
    %232 = arith.divf %230, %231 : vector<1x128xf32>
    %233 = vector.extract_strided_slice %226 {offsets = [0, 128], sizes = [1, 128], strides = [1, 1]} : vector<1x512xf32> to vector<1x128xf32>
    %234 = arith.negf %233 : vector<1x128xf32>
    %235 = math.exp %234 : vector<1x128xf32>
    %cst_49 = arith.constant 1.000000e+00 : f32
    %236 = vector.broadcast %cst_49 : f32 to vector<1x128xf32>
    %237 = arith.addf %236, %235 : vector<1x128xf32>
    %238 = arith.divf %236, %237 : vector<1x128xf32>
    %239 = vector.extract_strided_slice %226 {offsets = [0, 256], sizes = [1, 128], strides = [1, 1]} : vector<1x512xf32> to vector<1x128xf32>
    %240 = math.tanh %239 : vector<1x128xf32>
    %241 = vector.extract_strided_slice %226 {offsets = [0, 384], sizes = [1, 128], strides = [1, 1]} : vector<1x512xf32> to vector<1x128xf32>
    %242 = arith.negf %241 : vector<1x128xf32>
    %243 = math.exp %242 : vector<1x128xf32>
    %cst_50 = arith.constant 1.000000e+00 : f32
    %244 = vector.broadcast %cst_50 : f32 to vector<1x128xf32>
    %245 = arith.addf %244, %243 : vector<1x128xf32>
    %246 = arith.divf %244, %245 : vector<1x128xf32>
    %247 = arith.mulf %238, %218 : vector<1x128xf32>
    %248 = arith.mulf %232, %240 : vector<1x128xf32>
    %249 = arith.addf %247, %248 : vector<1x128xf32>
    %250 = math.tanh %249 : vector<1x128xf32>
    %251 = arith.mulf %246, %250 : vector<1x128xf32>
    %c7 = arith.constant 7 : index
    %c0_51 = arith.constant 0 : index
    %252 = vector.load %arg6[%c7, %c0_51] : memref<8x128xf32, #tpu.memory_space<vmem>>, vector<1x128xf32>
    tpu.vector_store %arg6[%c7, %c0_51], %251 {strides = array<i32>} : memref<8x128xf32, #tpu.memory_space<vmem>>, vector<1x128xf32>,
    %c0_52 = arith.constant 0 : index
    %c0_53 = arith.constant 0 : index
    %253 = vector.load %arg6[%c0_52, %c0_53] : memref<8x128xf32, #tpu.memory_space<vmem>>, vector<8x128xf32>
    %254 = arith.index_cast %4 : i32 to index
    %c0_54 = arith.constant 0 : index
    %255 = vector.load %arg5[%254, %c0_54] : memref<8x128xf32, #tpu.memory_space<vmem>>, vector<8x128xf32>
    tpu.vector_store %arg5[%254, %c0_54], %253 {strides = array<i32>} : memref<8x128xf32, #tpu.memory_space<vmem>>, vector<8x128xf32>,
    %c1_i32_55 = arith.constant 1 : i32
    %c0_56 = arith.constant 0 : index
    %c0_57 = arith.constant 0 : index
    %256 = vector.load %arg5[%c0_56, %c0_57] : memref<8x128xf32, #tpu.memory_space<vmem>>, vector<8x128xf32>
    %c0_58 = arith.constant 0 : index
    %c0_59 = arith.constant 0 : index
    %257 = vector.load %arg2[%c0_58, %c0_59] : memref<128x128xf32, #tpu.memory_space<vmem>>, vector<128x128xf32>
    %cst_60 = arith.constant dense<0.000000e+00> : vector<8x128xf32>
    %258 = tpu.matmul %256, %257, %cst_60 {dimension_numbers = #tpu.dot_dimension_numbers<[1], [0], [0], [1], [0, 0, 1, 1], [], []>} : vector<8x128xf32>, vector<128x128xf32>, vector<8x128xf32> -> vector<8x128xf32>
    %c0_61 = arith.constant 0 : index
    %c0_62 = arith.constant 0 : index
    %259 = vector.load %arg3[%c0_61, %c0_62] : memref<1x128xf32, #tpu.memory_space<vmem>>, vector<1x128xf32>
    %260 = vector.broadcast %259 : vector<1x128xf32> to vector<8x128xf32>
    %261 = arith.addf %258, %260 : vector<8x128xf32>
    %c0_63 = arith.constant 0 : index
    %c0_64 = arith.constant 0 : index
    %262 = vector.load %arg4[%c0_63, %c0_64] : memref<8x128xf32, #tpu.memory_space<vmem>>, vector<8x128xf32>
    tpu.vector_store %arg4[%c0_63, %c0_64], %261 {strides = array<i32>} : memref<8x128xf32, #tpu.memory_space<vmem>>, vector<8x128xf32>,
    return
  }
}

</mosaic_0001>

<bundles_post_ra>
// kernel: tpu_custom_call.1
= control target key start
LH: loop header
LB: loop body
LE: loop exit
PB: predicated region body
PF: predicated region fallthrough
CT: control target
= control target key end

     0   :  { %9 = vsyncpa [#allocation5], 0  ;;  %s3289_s0 = inlined_call_operand.hbm [shape: f32[8,512], index: 0, kind: input, shape index: {}]   ;;  %s3290_s1 = inlined_call_operand.hbm [shape: f32[128,512], index: 1, kind: input, shape index: {}]   ;;  %s3291_s2 = inlined_call_operand.hbm [shape: f32[128,128], index: 2, kind: input, shape index: {}]   ;;  %s3292_s3 = inlined_call_operand.vmem [shape: f32[1,128], index: 3, kind: input, shape index: {}]   ;;  %s3293_s4 = inlined_call_operand.hbm [shape: f32[8,128], index: 4, kind: output, shape index: {}]  }
   0x1   :  { %10 = vsyncpa [#allocation8], 0 }
   0x2   :  { %11 = vsyncpa [#allocation6], 0  ;;  %s2808_s15 = smov [#allocation7]   ;;  %s2714_s19 = scalar_lea.hbm %s3290_s1, 8192 }
   0x3   :  { %s27_s16 = sshll.u32 %s2808_s15, 4  ;;  %p2715_p0 = scmp.ne.s32.totalorder %s3290_s1, %s2714_s19  ;;  %s28_s16 = int_to_ptr.vmem [resolvable:$true] %s27_s16 }
   0x4   :  { %p2718_p1 = scmp.lt.u32.totalorder %s2714_s19, %s3290_s1 }
   0x6   :  { %p2720_p2 = pnand %p2718_p1, %p2715_p0 }
   0x8   :  { %2723 = shalt.err (!%p2720_p2)
}
   0x9   :  { %s2724_s24 = scalar_lea.vmem %s28_s16, 8192  ;;  %p2729_p4 = scmp.lt.s32.totalorder %s28_s16, %s28_s16 }
   0xa   :  { %p2725_p3 = scmp.ne.s32.totalorder %s28_s16, %s2724_s24  ;;  %p2730_p5 = scmp.lt.s32.totalorder %s2724_s24, %s2724_s24 }
   0xc   :  { %p2731_p6 = por %p2730_p5, %p2729_p4 }
   0xe   :  { %p2732_p7 = pnand %p2731_p6, %p2725_p3 }
  0x10   :  { %2735 = shalt.err (!%p2732_p7)
}
  0x11   :  { %s2809_s25 = smov 512   ;;  %s2810_s26 = smov 32  }
  0x12   :  { %33 = dma.hbm_to_vmem [thread:$0]  %s3290_s1, 8192, %s28_s16, [#allocation8], %s2809_s25, %s2809_s25, %s2810_s26  }
  0x13   :  { %s2811_s29 = smov [#allocation4]   ;;  %s2812_s5 = smov [#allocation9]  }
  0x14   :  { %s18_s30 = sshll.u32 %s2811_s29, 4  ;;  %s39_s6 = sshll.u32 %s2812_s5, 4  ;;  %s19_s30 = int_to_ptr.vmem [resolvable:$true] %s18_s30  ;;  %s40_s6 = int_to_ptr.vmem [resolvable:$true] %s39_s6 }
  0x15   :  { %s2736_s9 = scalar_lea.hbm %s3289_s0, 512 }
  0x16   :  { %p2737_p8 = scmp.ne.s32.totalorder %s3289_s0, %s2736_s9  ;;  %p2740_p9 = scmp.lt.u32.totalorder %s2736_s9, %s3289_s0 }
  0x18   :  { %p2742_p10 = pnand %p2740_p9, %p2737_p8 }
  0x1a   :  { %2745 = shalt.err (!%p2742_p10)
}
  0x1b   :  { %s2746_s1 = scalar_lea.vmem %s19_s30, 512  ;;  %p2751_p12 = scmp.lt.s32.totalorder %s19_s30, %s19_s30 }
  0x1c   :  { %p2747_p11 = scmp.ne.s32.totalorder %s19_s30, %s2746_s1  ;;  %p2752_p13 = scmp.lt.s32.totalorder %s2746_s1, %s2746_s1 }
  0x1e   :  { %p2753_p0 = por %p2752_p13, %p2751_p12 }
  0x20   :  { %p2754_p1 = pnand %p2753_p0, %p2747_p11 }
  0x22   :  { %2757 = shalt.err (!%p2754_p1)
}
  0x23   :  { %21 = dma.hbm_to_vmem [thread:$0]  %s3289_s0, 512, %s19_s30, [#allocation5]  }
  0x24   :  { %s2758_s18 = scalar_lea.hbm %s3291_s2, 2048 }
  0x25   :  { %p2759_p2 = scmp.ne.s32.totalorder %s3291_s2, %s2758_s18  ;;  %p2762_p3 = scmp.lt.u32.totalorder %s2758_s18, %s3291_s2 }
  0x27   :  { %p2764_p4 = pnand %p2762_p3, %p2759_p2 }
  0x29   :  { %2767 = shalt.err (!%p2764_p4)
}
  0x2a   :  { %s2768_s23 = scalar_lea.vmem %s40_s6, 2048  ;;  %p2773_p6 = scmp.lt.s32.totalorder %s40_s6, %s40_s6 }
  0x2b   :  { %p2769_p5 = scmp.ne.s32.totalorder %s40_s6, %s2768_s23  ;;  %p2774_p7 = scmp.lt.s32.totalorder %s2768_s23, %s2768_s23 }
  0x2d   :  { %p2775_p8 = por %p2774_p7, %p2773_p6 }
  0x2f   :  { %p2776_p9 = pnand %p2775_p8, %p2769_p5 }
  0x31   :  { %2779 = shalt.err (!%p2776_p9)
}
  0x32   :  { %s2813_s0 = smov 128   ;;  %s2814_s24 = smov 8  }
  0x33   :  { %45 = dma.hbm_to_vmem [thread:$0]  %s3291_s2, 2048, %s40_s6, [#allocation8], %s2813_s0, %s2813_s0, %s2814_s24  }
  0x34   :  { %2802 = dma.done.wait [#allocation5], 512  }
  0x35   :  { %2803 = vsyncadd [#allocation5], 4294966784 }
  0x36   :  { %2804 = dma.done.wait [#allocation8], 10240  }
  0x37   :  { %2805 = vsyncadd [#allocation8], 4294957056  ;;  %v2815_v0 = vmov 0.0   ;;  %v58_v1 = vld [vmem:[#allocation7 + $0x8] sm:$0xff]  ;;  %v60_v3 = vld [vmem:[#allocation7 + $0x18] sm:$0xff]  ;;  %vm2818_vm0 = vmmov 0  }
  0x38   :  { %189 = vmatprep.mubr.f32.mxu0 %v2815_v0  ;;  %260 = vmatprep.mubr.f32.mxu1 %v2815_v0  ;;  %v62_v2 = vld [vmem:[#allocation7 + $0x28] sm:$0xff]  ;;  %v64_v5 = vld [vmem:[#allocation7 + $0x38] sm:$0xff]  ;;  %v57_v6 = vld [vmem:[#allocation7] sm:$0xff]  ;;  %s2819_s28 = smov [#allocation10]  }
  0x39   :  { %v2883_v4 = vpack.c.bf16 %v62_v2, %v58_v1  ;;  %v61_v7 = vld [vmem:[#allocation7 + $0x20] sm:$0xff]  ;;  %v2885_v8 = vpack.c.bf16 %v64_v5, %v60_v3  ;;  %v59_v10 = vld [vmem:[#allocation7 + $0x10] sm:$0xff]  ;;  %v66_v12 = vld [vmem:[#allocation7 + $0x48] sm:$0xff]  ;;  %s1930_s29 = sshll.u32 %s2819_s28, 4  ;;  %s1931_s29 = int_to_ptr.vmem [resolvable:$true] %s1930_s29 }
  0x3a   :  { %v2887_v9 = vpack.c.bf16 %v61_v7, %v57_v6  ;;  %v63_v11 = vld [vmem:[#allocation7 + $0x30] sm:$0xff]  ;;  %v70_v14 = vld [vmem:[#allocation7 + $0x68] sm:$0xff]  ;;  %v68_v15 = vld [vmem:[#allocation7 + $0x58] sm:$0xff]  ;;  %s2780_s30 = scalar_lea.vmem %s1931_s29, 128  ;;  %p2785_p11 = scmp.lt.s32.totalorder %s1931_s29, %s1931_s29 }
  0x3b   :  { %2039 = vmatprep.subr.bf16.mxu0 %v2883_v4  ;;  %v2890_v13 = vpack.c.bf16 %v63_v11, %v59_v10  ;;  %v72_v16 = vld [vmem:[#allocation7 + $0x78] sm:$0xff]  ;;  %2071 = vmatprep.subr.bf16.mxu1 %v2885_v8  ;;  %v2894_v17 = vpack.c.bf16 %v70_v14, %v66_v12  ;;  %v65_v19 = vld [vmem:[#allocation7 + $0x40] sm:$0xff]  ;;  %v67_v21 = vld [vmem:[#allocation7 + $0x50] sm:$0xff]  ;;  %p2781_p10 = scmp.ne.s32.totalorder %s1931_s29, %s2780_s30  ;;  %p2786_p12 = scmp.lt.s32.totalorder %s2780_s30, %s2780_s30 }
  0x3c   :  { %2041 = vmatpush1.bf16.msra.mxu0 %v2887_v9  ;;  %v2896_v18 = vpack.c.bf16 %v72_v16, %v68_v15  ;;  %v69_v20 = vld [vmem:[#allocation7 + $0x60] sm:$0xff]  ;;  %v71_v23 = vld [vmem:[#allocation7 + $0x70] sm:$0xff]  ;;  %v74_v24 = vld [vmem:[#allocation7 + $0x88] sm:$0xff] }
  0x3d   :  { %2073 = vmatpush1.bf16.msra.mxu1 %v2890_v13  ;;  %v2899_v22 = vpack.c.bf16 %v69_v20, %v65_v19  ;;  %v78_v25 = vld [vmem:[#allocation7 + $0xa8] sm:$0xff]  ;;  %2043 = vmatprep.subr.bf16.mxu0 %v2894_v17  ;;  %v2903_v26 = vpack.c.bf16 %v71_v23, %v67_v21  ;;  %v76_v28 = vld [vmem:[#allocation7 + $0x98] sm:$0xff]  ;;  %v73_v30 = vld [vmem:[#allocation7 + $0x80] sm:$0xff]  ;;  %p2787_p13 = por %p2786_p12, %p2785_p11 }
  0x3e   :  { %2075 = vmatprep.subr.bf16.mxu1 %v2896_v18  ;;  %v2905_v27 = vpack.c.bf16 %v78_v25, %v74_v24  ;;  %v80_v29 = vld [vmem:[#allocation7 + $0xb8] sm:$0xff]  ;;  %v77_v32 = vld [vmem:[#allocation7 + $0xa0] sm:$0xff]  ;;  %v75_v33 = vld [vmem:[#allocation7 + $0x90] sm:$0xff] }
  0x3f   :  { %v2907_v31 = vpack.c.bf16 %v80_v29, %v76_v28  ;;  %v79_v34 = vld [vmem:[#allocation7 + $0xb0] sm:$0xff]  ;;  %v2910_v35 = vpack.c.bf16 %v77_v32, %v73_v30  ;;  %v82_v36 = vld [vmem:[#allocation7 + $0xc8] sm:$0xff]  ;;  %v84_v38 = vld [vmem:[#allocation7 + $0xd8] sm:$0xff]  ;;  %p2788_p0 = pnand %p2787_p13, %p2781_p10 }
  0x40   :  { %2045 = vmatpush1.bf16.msra.mxu0 %v2899_v22  ;;  %v86_v37 = vld [vmem:[#allocation7 + $0xe8] sm:$0xff]  ;;  %v2914_v39 = vpack.c.bf16 %v79_v34, %v75_v33  ;;  %v88_v41 = vld [vmem:[#allocation7 + $0xf8] sm:$0xff]  ;;  %v81_v42 = vld [vmem:[#allocation7 + $0xc0] sm:$0xff] }
  0x41   :  { %2077 = vmatpush1.bf16.msra.mxu1 %v2903_v26  ;;  %2047 = vmatprep.subr.bf16.mxu0 %v2905_v27  ;;  %v2916_v40 = vpack.c.bf16 %v86_v37, %v82_v36  ;;  %v85_v43 = vld [vmem:[#allocation7 + $0xe0] sm:$0xff]  ;;  %v2919_v44 = vpack.c.bf16 %v88_v41, %v84_v38  ;;  %v83_v45 = vld [vmem:[#allocation7 + $0xd0] sm:$0xff]  ;;  %v90_v47 = vld [vmem:[#allocation7 + $0x108] sm:$0xff] }
  0x42   :  { %2079 = vmatprep.subr.bf16.mxu1 %v2907_v31  ;;  %v87_v46 = vld [vmem:[#allocation7 + $0xf0] sm:$0xff]  ;;  %v94_v48 = vld [vmem:[#allocation7 + $0x128] sm:$0xff]  ;;  %v92_v49 = vld [vmem:[#allocation7 + $0x118] sm:$0xff]  ;;  %v2922_v51 = vpack.c.bf16 %v85_v43, %v81_v42 }
  0x43   :  { %v96_v50 = vld [vmem:[#allocation7 + $0x138] sm:$0xff]  ;;  %v2926_v52 = vpack.c.bf16 %v87_v46, %v83_v45  ;;  %v2928_v53 = vpack.c.bf16 %v94_v48, %v90_v47  ;;  %v89_v54 = vld [vmem:[#allocation7 + $0x100] sm:$0xff]  ;;  %v91_v56 = vld [vmem:[#allocation7 + $0x110] sm:$0xff]  ;;  %v2816_v48 = vmov 1966171168  }
  0x44   :  { %2049 = vmatpush1.bf16.msra.mxu0 %v2910_v35  ;;  %v93_v55 = vld [vmem:[#allocation7 + $0x120] sm:$0xff]  ;;  %v2931_v57 = vpack.c.bf16 %v96_v50, %v92_v49  ;;  %v95_v58 = vld [vmem:[#allocation7 + $0x130] sm:$0xff]  ;;  %v98_v59 = vld [vmem:[#allocation7 + $0x148] sm:$0xff]  ;;  %v274_v49 = vunpack.c.l.s4 %v2816_v48  ;;  %v276_v50 = vlaneseq }
  0x45   :  { %2081 = vmatpush1.bf16.msra.mxu1 %v2914_v39  ;;  %2051 = vmatprep.subr.bf16.mxu0 %v2916_v40  ;;  %v102_v60 = vld [vmem:[#allocation7 + $0x168] sm:$0xff]  ;;  %v100_v61 = vld [vmem:[#allocation7 + $0x158] sm:$0xff]  ;;  %v2934_v63 = vpack.c.bf16 %v93_v55, %v89_v54  ;;  %v2938_v1 = vpack.c.bf16 %v95_v58, %v91_v56  ;;  %v97_v3 = vld [vmem:[#allocation7 + $0x140] sm:$0xff] }
  0x46   :  { %2083 = vmatprep.subr.bf16.mxu1 %v2919_v44  ;;  %v104_v62 = vld [vmem:[#allocation7 + $0x178] sm:$0xff]  ;;  %v2940_v2 = vpack.c.bf16 %v102_v60, %v98_v59  ;;  %v101_v5 = vld [vmem:[#allocation7 + $0x160] sm:$0xff]  ;;  %v99_v6 = vld [vmem:[#allocation7 + $0x150] sm:$0xff]  ;;  %v275_v54 = vunpack.c.0.s8 %v274_v49  ;;  %v277_v55 = vshrl.u32 %v276_v50, 7 }
  0x47   :  { %v2943_v7 = vpack.c.bf16 %v104_v62, %v100_v61  ;;  %v103_v10 = vld [vmem:[#allocation7 + $0x170] sm:$0xff]  ;;  %v106_v11 = vld [vmem:[#allocation7 + $0x188] sm:$0xff]  ;;  %v108_v14 = vld [vmem:[#allocation7 + $0x198] sm:$0xff]  ;;  %v2946_v16 = vpack.c.bf16 %v101_v5, %v97_v3 }
  0x48   :  { %2053 = vmatpush1.bf16.msra.mxu0 %v2922_v51  ;;  %v110_v12 = vld [vmem:[#allocation7 + $0x1a8] sm:$0xff]  ;;  %v112_v15 = vld [vmem:[#allocation7 + $0x1b8] sm:$0xff]  ;;  %v2950_v19 = vpack.c.bf16 %v103_v10, %v99_v6  ;;  %v105_v21 = vld [vmem:[#allocation7 + $0x180] sm:$0xff]  ;;  %v3017_v58 = vsub.s32 %v275_v54, %v277_v55 }
  0x49   :  { %2085 = vmatpush1.bf16.msra.mxu1 %v2926_v52  ;;  %2055 = vmatprep.subr.bf16.mxu0 %v2928_v53  ;;  %v2952_v20 = vpack.c.bf16 %v110_v12, %v106_v11  ;;  %v109_v23 = vld [vmem:[#allocation7 + $0x1a0] sm:$0xff]  ;;  %v107_v24 = vld [vmem:[#allocation7 + $0x190] sm:$0xff]  ;;  %v2955_v25 = vpack.c.bf16 %v112_v15, %v108_v14  ;;  %v114_v29 = vld [vmem:[#allocation7 + $0x1c8] sm:$0xff] }
  0x4a   :  { %2087 = vmatprep.subr.bf16.mxu1 %v2931_v57  ;;  %v111_v28 = vld [vmem:[#allocation7 + $0x1b0] sm:$0xff]  ;;  %v118_v30 = vld [vmem:[#allocation7 + $0x1e8] sm:$0xff]  ;;  %v116_v32 = vld [vmem:[#allocation7 + $0x1d8] sm:$0xff]  ;;  %v2958_v34 = vpack.c.bf16 %v109_v23, %v105_v21 }
  0x4b   :  { %v120_v33 = vld [vmem:[#allocation7 + $0x1f8] sm:$0xff]  ;;  %v2962_v36 = vpack.c.bf16 %v111_v28, %v107_v24  ;;  %v2964_v37 = vpack.c.bf16 %v118_v30, %v114_v29  ;;  %v113_v38 = vld [vmem:[#allocation7 + $0x1c0] sm:$0xff]  ;;  %v115_v43 = vld [vmem:[#allocation7 + $0x1d0] sm:$0xff] }
  0x4c   :  { %2057 = vmatpush1.bf16.msra.mxu0 %v2934_v63  ;;  %v117_v41 = vld [vmem:[#allocation7 + $0x1e0] sm:$0xff]  ;;  %v2967_v42 = vpack.c.bf16 %v120_v33, %v116_v32  ;;  %v119_v45 = vld [vmem:[#allocation7 + $0x1f0] sm:$0xff] }
  0x4d   :  { %2089 = vmatpush1.bf16.msra.mxu1 %v2938_v1  ;;  %2059 = vmatprep.subr.bf16.mxu0 %v2940_v2  ;;  %v2970_v46 = vpack.c.bf16 %v117_v41, %v113_v38  ;;  %v2974_v47 = vpack.c.bf16 %v119_v45, %v115_v43  ;;  %v124_v11 = vld [vmem:[#allocation4] ss:$8 sm:$0xf] }
  0x4e   :  { %2091 = vmatprep.subr.bf16.mxu1 %v2943_v7 }
  0x50   :  { %2061 = vmatpush1.bf16.msra.mxu0 %v2946_v16 }
  0x51   :  { %2093 = vmatpush1.bf16.msra.mxu1 %v2950_v19  ;;  %2063 = vmatprep.subr.bf16.mxu0 %v2952_v20 }
  0x52   :  { %2095 = vmatprep.subr.bf16.mxu1 %v2955_v25 }
  0x54   :  { %2065 = vmatpush1.bf16.msra.mxu0 %v2958_v34 }
  0x55   :  { %2097 = vmatpush1.bf16.msra.mxu1 %v2962_v36  ;;  %2067 = vmatprep.subr.bf16.mxu0 %v2964_v37 }
  0x56   :  { %2099 = vmatprep.subr.bf16.mxu1 %v2967_v42 }
  0x58   :  { %2069 = vmatpush1.bf16.msra.mxu0 %v2970_v46 }
  0x59   :  { %2101 = vmatpush1.bf16.msra.mxu1 %v2974_v47  ;;  %2103 = vmatprep.subr.bf16.mxu0 %v2883_v4 }
  0x5a   :  { %2135 = vmatprep.subr.bf16.mxu1 %v2885_v8 }
  0x5b   :  { %190 = vmatmul.mubr.f32.vlgmr.msra.gmra.mrb[0].mxu0 %v2815_v0 }
  0x5c   :  { %261 = vmatmul.mubr.f32.vlgmr.msra.gmra.mrb[0].mxu1 %v2815_v0  ;;  %2105 = vmatpush1.bf16.msra.mxu0 %v2887_v9 }
  0x5d   :  { %2137 = vmatpush1.bf16.msra.mxu1 %v2890_v13  ;;  %2107 = vmatprep.subr.bf16.mxu0 %v2894_v17 }
  0x5e   :  { %2139 = vmatprep.subr.bf16.mxu1 %v2896_v18  ;;  %403 = vmatprep.mubr.f32.mxu0 %v2815_v0 }
  0x5f   :  { %474 = vmatprep.mubr.f32.mxu1 %v2815_v0 }
  0x60   :  { %2109 = vmatpush1.bf16.msra.mxu0 %v2899_v22 }
  0x61   :  { %2141 = vmatpush1.bf16.msra.mxu1 %v2903_v26  ;;  %2111 = vmatprep.subr.bf16.mxu0 %v2905_v27 }
  0x62   :  { %2143 = vmatprep.subr.bf16.mxu1 %v2907_v31 }
  0x64   :  { %2113 = vmatpush1.bf16.msra.mxu0 %v2910_v35 }
  0x65   :  { %2145 = vmatpush1.bf16.msra.mxu1 %v2914_v39  ;;  %2115 = vmatprep.subr.bf16.mxu0 %v2916_v40 }
  0x66   :  { %2147 = vmatprep.subr.bf16.mxu1 %v2919_v44 }
  0x68   :  { %2117 = vmatpush1.bf16.msra.mxu0 %v2922_v51 }
  0x69   :  { %2149 = vmatpush1.bf16.msra.mxu1 %v2926_v52  ;;  %2119 = vmatprep.subr.bf16.mxu0 %v2928_v53 }
  0x6a   :  { %2151 = vmatprep.subr.bf16.mxu1 %v2931_v57 }
  0x6c   :  { %2121 = vmatpush1.bf16.msra.mxu0 %v2934_v63 }
  0x6d   :  { %2153 = vmatpush1.bf16.msra.mxu1 %v2938_v1  ;;  %2123 = vmatprep.subr.bf16.mxu0 %v2940_v2 }
  0x6e   :  { %2155 = vmatprep.subr.bf16.mxu1 %v2943_v7 }
  0x70   :  { %2125 = vmatpush1.bf16.msra.mxu0 %v2946_v16 }
  0x71   :  { %2157 = vmatpush1.bf16.msra.mxu1 %v2950_v19  ;;  %2127 = vmatprep.subr.bf16.mxu0 %v2952_v20 }
  0x72   :  { %2159 = vmatprep.subr.bf16.mxu1 %v2955_v25 }
  0x74   :  { %2129 = vmatpush1.bf16.msra.mxu0 %v2958_v34 }
  0x75   :  { %2161 = vmatpush1.bf16.msra.mxu1 %v2962_v36  ;;  %2131 = vmatprep.subr.bf16.mxu0 %v2964_v37 }
  0x76   :  { %2163 = vmatprep.subr.bf16.mxu1 %v2967_v42 }
  0x78   :  { %2133 = vmatpush1.bf16.msra.mxu0 %v2970_v46 }
  0x79   :  { %2165 = vmatpush1.bf16.msra.mxu1 %v2974_v47  ;;  %2167 = vmatprep.subr.bf16.mxu0 %v2883_v4 }
  0x7a   :  { %2199 = vmatprep.subr.bf16.mxu1 %v2885_v8 }
 0x12e   :  { %v191_v56 = vpop.f32.mrb[0].mxu0 }
 0x12f   :  { %v262_v59 = vpop.f32.mrb[0].mxu1  ;;  %v193_v60 = vpop.f32.mrb[1].mxu0 }
 0x130   :  { %v271_v61 = vcombine.low %v191_v56, %v193_v60  ;;  %v264_v62 = vpop.f32.mrb[1].mxu1 }
 0x131   :  { %v272_v3 = vcombine.low %v262_v59, %v264_v62 }
 0x132   :  { %v279_v5 = vrot.slane %v271_v61, %v3017_v58 }
 0x133   :  { %v286_v6 = vrot.slane %v272_v3, %v3017_v58 }
 0x135   :  { %v287_v10 = vcombine.low %v279_v5, %v286_v6 }
 0x137   :  { %v294_v12 = vrot.slane %v287_v10, %v3017_v58 }
 0x139   :  { %v296_v14 = vadd.f32 %v294_v12, %v124_v11 }
 0x13b   :  { %v1961_v15 = vmul.f32 -1.442695, %v296_v14  ;;  %v304_v21 = vrot.slane %v296_v14, 1  ;;  %v315_v24 = vrot.slane %v296_v14, 3  ;;  %v312_v30 = vrot.slane %v296_v14, 2 }
 0x13d   :  { %2586 = vpow2.f32 %v1961_v15  ;;  %v1962_v23 = vmul.f32 -1.442695, %v304_v21  ;;  %v1963_v28 = vmul.f32 -1.442695, %v315_v24 }
 0x13e   :  { %v338_v15 = vld [vmem:[#allocation4 + $0x1] ss:$8 sm:$0xf] }
 0x13f   :  { %2588 = vpow2.f32 %v1962_v23 }
 0x140   :  { %2590 = vpow2.f32 %v1963_v28 }
 0x147   :  { %v2587_v29 = vpop.eup %2586 }
 0x148   :  { %v300_v32 = vadd.f32 1.0, %v2587_v29 }
 0x149   :  { %v2589_v33 = vpop.eup %2588 }
 0x14a   :  { %2592 = vrcp.f32 %v300_v32  ;;  %v309_v38 = vadd.f32 1.0, %v2589_v33  ;;  %v2591_v41 = vpop.eup %2590 }
 0x14b   :  { %2594 = vtanh.f32 %v312_v30  ;;  %v320_v49 = vadd.f32 1.0, %v2591_v41 }
 0x14c   :  { %2596 = vrcp.f32 %v309_v38 }
 0x14d   :  { %2598 = vrcp.f32 %v320_v49 }
 0x154   :  { %v2593_v43 = vpop.eup %2592 }
 0x155   :  { %v2595_v45 = vpop.eup %2594 }
 0x156   :  { %v2597_v48 = vpop.eup %2596  ;;  %v324_v54 = vmul.f32 %v2595_v45, %v2593_v43 }
 0x157   :  { %v323_v50 = vmul.f32 0.0, %v2597_v48  ;;  %v2599_v56 = vpop.eup %2598 }
 0x159   :  { %v3022_v55 = vadd.f32 %v324_v54, %v323_v50 }
 0x15b   :  { %2600 = vtanh.f32 %v3022_v55 }
 0x165   :  { %v2601_v59 = vpop.eup %2600 }
 0x166   :  { %v327_v60 = vmul.f32 %v2601_v59, %v2599_v56 }
 0x168   :  { %328 = vst [vmem:[#allocation3] sm:$0x1] %v327_v60  ;;  %404 = vmatmul.mubr.f32.vlgmr.msra.gmra.mrb[2].mxu0 %v327_v60  ;;  %475 = vmatmul.mubr.f32.vlgmr.msra.gmra.mrb[2].mxu1 %v327_v60 }
 0x169   :  { %2169 = vmatpush1.bf16.msra.mxu0 %v2887_v9  ;;  %2201 = vmatpush1.bf16.msra.mxu1 %v2890_v13 }
 0x16a   :  { %2171 = vmatprep.subr.bf16.mxu0 %v2894_v17  ;;  %2203 = vmatprep.subr.bf16.mxu1 %v2896_v18 }
 0x16b   :  { %617 = vmatprep.mubr.f32.mxu0 %v2815_v0  ;;  %688 = vmatprep.mubr.f32.mxu1 %v2815_v0 }
 0x16d   :  { %2173 = vmatpush1.bf16.msra.mxu0 %v2899_v22  ;;  %2205 = vmatpush1.bf16.msra.mxu1 %v2903_v26 }
 0x16e   :  { %2175 = vmatprep.subr.bf16.mxu0 %v2905_v27  ;;  %2207 = vmatprep.subr.bf16.mxu1 %v2907_v31 }
 0x171   :  { %2177 = vmatpush1.bf16.msra.mxu0 %v2910_v35  ;;  %2209 = vmatpush1.bf16.msra.mxu1 %v2914_v39 }
 0x172   :  { %2179 = vmatprep.subr.bf16.mxu0 %v2916_v40  ;;  %2211 = vmatprep.subr.bf16.mxu1 %v2919_v44 }
 0x175   :  { %2181 = vmatpush1.bf16.msra.mxu0 %v2922_v51  ;;  %2213 = vmatpush1.bf16.msra.mxu1 %v2926_v52 }
 0x176   :  { %2183 = vmatprep.subr.bf16.mxu0 %v2928_v53  ;;  %2215 = vmatprep.subr.bf16.mxu1 %v2931_v57 }
 0x179   :  { %2185 = vmatpush1.bf16.msra.mxu0 %v2934_v63  ;;  %2217 = vmatpush1.bf16.msra.mxu1 %v2938_v1 }
 0x17a   :  { %2187 = vmatprep.subr.bf16.mxu0 %v2940_v2  ;;  %2219 = vmatprep.subr.bf16.mxu1 %v2943_v7 }
 0x17d   :  { %2189 = vmatpush1.bf16.msra.mxu0 %v2946_v16  ;;  %2221 = vmatpush1.bf16.msra.mxu1 %v2950_v19 }
 0x17e   :  { %2191 = vmatprep.subr.bf16.mxu0 %v2952_v20  ;;  %2223 = vmatprep.subr.bf16.mxu1 %v2955_v25 }
 0x181   :  { %2193 = vmatpush1.bf16.msra.mxu0 %v2958_v34  ;;  %2225 = vmatpush1.bf16.msra.mxu1 %v2962_v36 }
 0x182   :  { %2195 = vmatprep.subr.bf16.mxu0 %v2964_v37  ;;  %2227 = vmatprep.subr.bf16.mxu1 %v2967_v42 }
 0x185   :  { %2197 = vmatpush1.bf16.msra.mxu0 %v2970_v46  ;;  %2229 = vmatpush1.bf16.msra.mxu1 %v2974_v47 }
 0x186   :  { %2231 = vmatprep.subr.bf16.mxu0 %v2883_v4  ;;  %2263 = vmatprep.subr.bf16.mxu1 %v2885_v8 }
 0x23b   :  { %v405_v61 = vpop.f32.mrb[2].mxu0  ;;  %v476_v62 = vpop.f32.mrb[2].mxu1 }
 0x23c   :  { %v407_v3 = vpop.f32.mrb[3].mxu0  ;;  %v478_v5 = vpop.f32.mrb[3].mxu1 }
 0x23d   :  { %v485_v6 = vcombine.low %v405_v61, %v407_v3  ;;  %v486_v10 = vcombine.low %v476_v62, %v478_v5 }
 0x23f   :  { %v493_v11 = vrot.slane %v485_v6, %v3017_v58  ;;  %v500_v12 = vrot.slane %v486_v10, %v3017_v58 }
 0x241   :  { %v501_v14 = vcombine.low %v493_v11, %v500_v12 }
 0x243   :  { %v508_v21 = vrot.slane %v501_v14, %v3017_v58 }
 0x245   :  { %v510_v23 = vadd.f32 %v508_v21, %v338_v15 }
 0x247   :  { %v1964_v24 = vmul.f32 -1.442695, %v510_v23  ;;  %v518_v28 = vrot.slane %v510_v23, 1  ;;  %v529_v30 = vrot.slane %v510_v23, 3  ;;  %v526_v38 = vrot.slane %v510_v23, 2 }
 0x249   :  { %2602 = vpow2.f32 %v1964_v24  ;;  %v1965_v29 = vmul.f32 -1.442695, %v518_v28  ;;  %v1966_v32 = vmul.f32 -1.442695, %v529_v30 }
 0x24a   :  { %v552_v24 = vld [vmem:[#allocation4 + $0x2] ss:$8 sm:$0xf] }
 0x24b   :  { %2604 = vpow2.f32 %v1965_v29 }
 0x24c   :  { %2606 = vpow2.f32 %v1966_v32 }
 0x253   :  { %v2603_v33 = vpop.eup %2602 }
 0x254   :  { %v514_v41 = vadd.f32 1.0, %v2603_v33 }
 0x255   :  { %v2605_v43 = vpop.eup %2604 }
 0x256   :  { %2608 = vrcp.f32 %v514_v41  ;;  %v523_v45 = vadd.f32 1.0, %v2605_v43  ;;  %v2607_v48 = vpop.eup %2606 }
 0x257   :  { %2610 = vtanh.f32 %v526_v38  ;;  %v534_v56 = vadd.f32 1.0, %v2607_v48 }
 0x258   :  { %2612 = vrcp.f32 %v523_v45 }
 0x259   :  { %2614 = vrcp.f32 %v534_v56 }
 0x260   :  { %v2609_v49 = vpop.eup %2608 }
 0x261   :  { %v2611_v50 = vpop.eup %2610 }
 0x262   :  { %v2613_v54 = vpop.eup %2612  ;;  %v538_v60 = vmul.f32 %v2611_v50, %v2609_v49 }
 0x263   :  { %v537_v59 = vmul.f32 %v2613_v54, %v3022_v55  ;;  %v2615_v62 = vpop.eup %2614 }
 0x265   :  { %v3063_v61 = vadd.f32 %v538_v60, %v537_v59 }
 0x267   :  { %2616 = vtanh.f32 %v3063_v61 }
 0x271   :  { %v2617_v3 = vpop.eup %2616 }
 0x272   :  { %v541_v5 = vmul.f32 %v2617_v3, %v2615_v62 }
 0x274   :  { %542 = vst [vmem:[#allocation3 + $0x1] sm:$0x1] %v541_v5  ;;  %618 = vmatmul.mubr.f32.vlgmr.msra.gmra.mrb[4].mxu0 %v541_v5  ;;  %689 = vmatmul.mubr.f32.vlgmr.msra.gmra.mrb[4].mxu1 %v541_v5 }
 0x275   :  { %2233 = vmatpush1.bf16.msra.mxu0 %v2887_v9  ;;  %2265 = vmatpush1.bf16.msra.mxu1 %v2890_v13 }
 0x276   :  { %2235 = vmatprep.subr.bf16.mxu0 %v2894_v17  ;;  %2267 = vmatprep.subr.bf16.mxu1 %v2896_v18 }
 0x277   :  { %831 = vmatprep.mubr.f32.mxu0 %v2815_v0  ;;  %902 = vmatprep.mubr.f32.mxu1 %v2815_v0 }
 0x279   :  { %2237 = vmatpush1.bf16.msra.mxu0 %v2899_v22  ;;  %2269 = vmatpush1.bf16.msra.mxu1 %v2903_v26 }
 0x27a   :  { %2239 = vmatprep.subr.bf16.mxu0 %v2905_v27  ;;  %2271 = vmatprep.subr.bf16.mxu1 %v2907_v31 }
 0x27d   :  { %2241 = vmatpush1.bf16.msra.mxu0 %v2910_v35  ;;  %2273 = vmatpush1.bf16.msra.mxu1 %v2914_v39 }
 0x27e   :  { %2243 = vmatprep.subr.bf16.mxu0 %v2916_v40  ;;  %2275 = vmatprep.subr.bf16.mxu1 %v2919_v44 }
 0x281   :  { %2245 = vmatpush1.bf16.msra.mxu0 %v2922_v51  ;;  %2277 = vmatpush1.bf16.msra.mxu1 %v2926_v52 }
 0x282   :  { %2247 = vmatprep.subr.bf16.mxu0 %v2928_v53  ;;  %2279 = vmatprep.subr.bf16.mxu1 %v2931_v57 }
 0x285   :  { %2249 = vmatpush1.bf16.msra.mxu0 %v2934_v63  ;;  %2281 = vmatpush1.bf16.msra.mxu1 %v2938_v1 }
 0x286   :  { %2251 = vmatprep.subr.bf16.mxu0 %v2940_v2  ;;  %2283 = vmatprep.subr.bf16.mxu1 %v2943_v7 }
 0x289   :  { %2253 = vmatpush1.bf16.msra.mxu0 %v2946_v16  ;;  %2285 = vmatpush1.bf16.msra.mxu1 %v2950_v19 }
 0x28a   :  { %2255 = vmatprep.subr.bf16.mxu0 %v2952_v20  ;;  %2287 = vmatprep.subr.bf16.mxu1 %v2955_v25 }
 0x28d   :  { %2257 = vmatpush1.bf16.msra.mxu0 %v2958_v34  ;;  %2289 = vmatpush1.bf16.msra.mxu1 %v2962_v36 }
 0x28e   :  { %2259 = vmatprep.subr.bf16.mxu0 %v2964_v37  ;;  %2291 = vmatprep.subr.bf16.mxu1 %v2967_v42 }
 0x291   :  { %2261 = vmatpush1.bf16.msra.mxu0 %v2970_v46  ;;  %2293 = vmatpush1.bf16.msra.mxu1 %v2974_v47 }
 0x292   :  { %2295 = vmatprep.subr.bf16.mxu0 %v2883_v4  ;;  %2327 = vmatprep.subr.bf16.mxu1 %v2885_v8 }
 0x347   :  { %v619_v55 = vpop.f32.mrb[4].mxu0  ;;  %v690_v6 = vpop.f32.mrb[4].mxu1 }
 0x348   :  { %v621_v10 = vpop.f32.mrb[5].mxu0  ;;  %v692_v11 = vpop.f32.mrb[5].mxu1 }
 0x349   :  { %v699_v12 = vcombine.low %v619_v55, %v621_v10  ;;  %v700_v14 = vcombine.low %v690_v6, %v692_v11 }
 0x34b   :  { %v707_v15 = vrot.slane %v699_v12, %v3017_v58  ;;  %v714_v21 = vrot.slane %v700_v14, %v3017_v58 }
 0x34d   :  { %v715_v23 = vcombine.low %v707_v15, %v714_v21 }
 0x34f   :  { %v722_v28 = vrot.slane %v715_v23, %v3017_v58 }
 0x351   :  { %v724_v29 = vadd.f32 %v722_v28, %v552_v24 }
 0x353   :  { %v1967_v30 = vmul.f32 -1.442695, %v724_v29  ;;  %v732_v32 = vrot.slane %v724_v29, 1  ;;  %v743_v38 = vrot.slane %v724_v29, 3  ;;  %v740_v45 = vrot.slane %v724_v29, 2 }
 0x355   :  { %2618 = vpow2.f32 %v1967_v30  ;;  %v1968_v33 = vmul.f32 -1.442695, %v732_v32  ;;  %v1969_v41 = vmul.f32 -1.442695, %v743_v38 }
 0x356   :  { %v766_v30 = vld [vmem:[#allocation4 + $0x3] ss:$8 sm:$0xf] }
 0x357   :  { %2620 = vpow2.f32 %v1968_v33 }
 0x358   :  { %2622 = vpow2.f32 %v1969_v41 }
 0x35f   :  { %v2619_v43 = vpop.eup %2618 }
 0x360   :  { %v728_v48 = vadd.f32 1.0, %v2619_v43 }
 0x361   :  { %v2621_v49 = vpop.eup %2620 }
 0x362   :  { %2624 = vrcp.f32 %v728_v48  ;;  %v737_v50 = vadd.f32 1.0, %v2621_v49  ;;  %v2623_v54 = vpop.eup %2622 }
 0x363   :  { %2626 = vtanh.f32 %v740_v45  ;;  %v748_v62 = vadd.f32 1.0, %v2623_v54 }
 0x364   :  { %2628 = vrcp.f32 %v737_v50 }
 0x365   :  { %2630 = vrcp.f32 %v748_v62 }
 0x36c   :  { %v2625_v56 = vpop.eup %2624 }
 0x36d   :  { %v2627_v59 = vpop.eup %2626 }
 0x36e   :  { %v2629_v60 = vpop.eup %2628  ;;  %v752_v5 = vmul.f32 %v2627_v59, %v2625_v56 }
 0x36f   :  { %v751_v3 = vmul.f32 %v2629_v60, %v3063_v61  ;;  %v2631_v6 = vpop.eup %2630 }
 0x371   :  { %v3104_v55 = vadd.f32 %v752_v5, %v751_v3 }
 0x373   :  { %2632 = vtanh.f32 %v3104_v55 }
 0x37d   :  { %v2633_v10 = vpop.eup %2632 }
 0x37e   :  { %v755_v11 = vmul.f32 %v2633_v10, %v2631_v6 }
 0x380   :  { %756 = vst [vmem:[#allocation3 + $0x2] sm:$0x1] %v755_v11  ;;  %832 = vmatmul.mubr.f32.vlgmr.msra.gmra.mrb[6].mxu0 %v755_v11  ;;  %903 = vmatmul.mubr.f32.vlgmr.msra.gmra.mrb[6].mxu1 %v755_v11 }
 0x381   :  { %2297 = vmatpush1.bf16.msra.mxu0 %v2887_v9  ;;  %2329 = vmatpush1.bf16.msra.mxu1 %v2890_v13 }
 0x382   :  { %2299 = vmatprep.subr.bf16.mxu0 %v2894_v17  ;;  %2331 = vmatprep.subr.bf16.mxu1 %v2896_v18 }
 0x383   :  { %1045 = vmatprep.mubr.f32.mxu0 %v2815_v0  ;;  %1116 = vmatprep.mubr.f32.mxu1 %v2815_v0 }
 0x385   :  { %2301 = vmatpush1.bf16.msra.mxu0 %v2899_v22  ;;  %2333 = vmatpush1.bf16.msra.mxu1 %v2903_v26 }
 0x386   :  { %2303 = vmatprep.subr.bf16.mxu0 %v2905_v27  ;;  %2335 = vmatprep.subr.bf16.mxu1 %v2907_v31 }
 0x389   :  { %2305 = vmatpush1.bf16.msra.mxu0 %v2910_v35  ;;  %2337 = vmatpush1.bf16.msra.mxu1 %v2914_v39 }
 0x38a   :  { %2307 = vmatprep.subr.bf16.mxu0 %v2916_v40  ;;  %2339 = vmatprep.subr.bf16.mxu1 %v2919_v44 }
 0x38d   :  { %2309 = vmatpush1.bf16.msra.mxu0 %v2922_v51  ;;  %2341 = vmatpush1.bf16.msra.mxu1 %v2926_v52 }
 0x38e   :  { %2311 = vmatprep.subr.bf16.mxu0 %v2928_v53  ;;  %2343 = vmatprep.subr.bf16.mxu1 %v2931_v57 }
 0x391   :  { %2313 = vmatpush1.bf16.msra.mxu0 %v2934_v63  ;;  %2345 = vmatpush1.bf16.msra.mxu1 %v2938_v1 }
 0x392   :  { %2315 = vmatprep.subr.bf16.mxu0 %v2940_v2  ;;  %2347 = vmatprep.subr.bf16.mxu1 %v2943_v7 }
 0x395   :  { %2317 = vmatpush1.bf16.msra.mxu0 %v2946_v16  ;;  %2349 = vmatpush1.bf16.msra.mxu1 %v2950_v19 }
 0x396   :  { %2319 = vmatprep.subr.bf16.mxu0 %v2952_v20  ;;  %2351 = vmatprep.subr.bf16.mxu1 %v2955_v25 }
 0x399   :  { %2321 = vmatpush1.bf16.msra.mxu0 %v2958_v34  ;;  %2353 = vmatpush1.bf16.msra.mxu1 %v2962_v36 }
 0x39a   :  { %2323 = vmatprep.subr.bf16.mxu0 %v2964_v37  ;;  %2355 = vmatprep.subr.bf16.mxu1 %v2967_v42 }
 0x39d   :  { %2325 = vmatpush1.bf16.msra.mxu0 %v2970_v46  ;;  %2357 = vmatpush1.bf16.msra.mxu1 %v2974_v47 }
 0x39e   :  { %2359 = vmatprep.subr.bf16.mxu0 %v2883_v4  ;;  %2391 = vmatprep.subr.bf16.mxu1 %v2885_v8 }
 0x453   :  { %v833_v61 = vpop.f32.mrb[6].mxu0  ;;  %v904_v12 = vpop.f32.mrb[6].mxu1 }
 0x454   :  { %v835_v14 = vpop.f32.mrb[7].mxu0  ;;  %v906_v15 = vpop.f32.mrb[7].mxu1 }
 0x455   :  { %v913_v21 = vcombine.low %v833_v61, %v835_v14  ;;  %v914_v23 = vcombine.low %v904_v12, %v906_v15 }
 0x457   :  { %v921_v24 = vrot.slane %v913_v21, %v3017_v58  ;;  %v928_v28 = vrot.slane %v914_v23, %v3017_v58 }
 0x459   :  { %v929_v29 = vcombine.low %v921_v24, %v928_v28 }
 0x45b   :  { %v936_v32 = vrot.slane %v929_v29, %v3017_v58 }
 0x45d   :  { %v938_v33 = vadd.f32 %v936_v32, %v766_v30 }
 0x45f   :  { %v1970_v38 = vmul.f32 -1.442695, %v938_v33  ;;  %v946_v41 = vrot.slane %v938_v33, 1  ;;  %v957_v45 = vrot.slane %v938_v33, 3  ;;  %v954_v50 = vrot.slane %v938_v33, 2 }
 0x461   :  { %2634 = vpow2.f32 %v1970_v38  ;;  %v1971_v43 = vmul.f32 -1.442695, %v946_v41  ;;  %v1972_v48 = vmul.f32 -1.442695, %v957_v45 }
 0x462   :  { %v980_v38 = vld [vmem:[#allocation4 + $0x4] ss:$8 sm:$0xf] }
 0x463   :  { %2636 = vpow2.f32 %v1971_v43 }
 0x464   :  { %2638 = vpow2.f32 %v1972_v48 }
 0x46b   :  { %v2635_v49 = vpop.eup %2634 }
 0x46c   :  { %v942_v54 = vadd.f32 1.0, %v2635_v49 }
 0x46d   :  { %v2637_v56 = vpop.eup %2636 }
 0x46e   :  { %2640 = vrcp.f32 %v942_v54  ;;  %v951_v59 = vadd.f32 1.0, %v2637_v56  ;;  %v2639_v60 = vpop.eup %2638 }
 0x46f   :  { %2642 = vtanh.f32 %v954_v50  ;;  %v962_v6 = vadd.f32 1.0, %v2639_v60 }
 0x470   :  { %2644 = vrcp.f32 %v951_v59 }
 0x471   :  { %2646 = vrcp.f32 %v962_v6 }
 0x478   :  { %v2641_v62 = vpop.eup %2640 }
 0x479   :  { %v2643_v3 = vpop.eup %2642 }
 0x47a   :  { %v2645_v5 = vpop.eup %2644  ;;  %v966_v11 = vmul.f32 %v2643_v3, %v2641_v62 }
 0x47b   :  { %v965_v10 = vmul.f32 %v2645_v5, %v3104_v55  ;;  %v2647_v12 = vpop.eup %2646 }
 0x47d   :  { %v3145_v61 = vadd.f32 %v966_v11, %v965_v10 }
 0x47f   :  { %2648 = vtanh.f32 %v3145_v61 }
 0x489   :  { %v2649_v14 = vpop.eup %2648 }
 0x48a   :  { %v969_v15 = vmul.f32 %v2649_v14, %v2647_v12 }
 0x48c   :  { %970 = vst [vmem:[#allocation3 + $0x3] sm:$0x1] %v969_v15  ;;  %1046 = vmatmul.mubr.f32.vlgmr.msra.gmra.mrb[8].mxu0 %v969_v15  ;;  %1117 = vmatmul.mubr.f32.vlgmr.msra.gmra.mrb[8].mxu1 %v969_v15 }
 0x48d   :  { %2361 = vmatpush1.bf16.msra.mxu0 %v2887_v9  ;;  %2393 = vmatpush1.bf16.msra.mxu1 %v2890_v13 }
 0x48e   :  { %2363 = vmatprep.subr.bf16.mxu0 %v2894_v17  ;;  %2395 = vmatprep.subr.bf16.mxu1 %v2896_v18 }
 0x48f   :  { %1259 = vmatprep.mubr.f32.mxu0 %v2815_v0  ;;  %1330 = vmatprep.mubr.f32.mxu1 %v2815_v0 }
 0x491   :  { %2365 = vmatpush1.bf16.msra.mxu0 %v2899_v22  ;;  %2397 = vmatpush1.bf16.msra.mxu1 %v2903_v26 }
 0x492   :  { %2367 = vmatprep.subr.bf16.mxu0 %v2905_v27  ;;  %2399 = vmatprep.subr.bf16.mxu1 %v2907_v31 }
 0x495   :  { %2369 = vmatpush1.bf16.msra.mxu0 %v2910_v35  ;;  %2401 = vmatpush1.bf16.msra.mxu1 %v2914_v39 }
 0x496   :  { %2371 = vmatprep.subr.bf16.mxu0 %v2916_v40  ;;  %2403 = vmatprep.subr.bf16.mxu1 %v2919_v44 }
 0x499   :  { %2373 = vmatpush1.bf16.msra.mxu0 %v2922_v51  ;;  %2405 = vmatpush1.bf16.msra.mxu1 %v2926_v52 }
 0x49a   :  { %2375 = vmatprep.subr.bf16.mxu0 %v2928_v53  ;;  %2407 = vmatprep.subr.bf16.mxu1 %v2931_v57 }
 0x49d   :  { %2377 = vmatpush1.bf16.msra.mxu0 %v2934_v63  ;;  %2409 = vmatpush1.bf16.msra.mxu1 %v2938_v1 }
 0x49e   :  { %2379 = vmatprep.subr.bf16.mxu0 %v2940_v2  ;;  %2411 = vmatprep.subr.bf16.mxu1 %v2943_v7 }
 0x4a1   :  { %2381 = vmatpush1.bf16.msra.mxu0 %v2946_v16  ;;  %2413 = vmatpush1.bf16.msra.mxu1 %v2950_v19 }
 0x4a2   :  { %2383 = vmatprep.subr.bf16.mxu0 %v2952_v20  ;;  %2415 = vmatprep.subr.bf16.mxu1 %v2955_v25 }
 0x4a5   :  { %2385 = vmatpush1.bf16.msra.mxu0 %v2958_v34  ;;  %2417 = vmatpush1.bf16.msra.mxu1 %v2962_v36 }
 0x4a6   :  { %2387 = vmatprep.subr.bf16.mxu0 %v2964_v37  ;;  %2419 = vmatprep.subr.bf16.mxu1 %v2967_v42 }
 0x4a9   :  { %2389 = vmatpush1.bf16.msra.mxu0 %v2970_v46  ;;  %2421 = vmatpush1.bf16.msra.mxu1 %v2974_v47 }
 0x4aa   :  { %2423 = vmatprep.subr.bf16.mxu0 %v2883_v4  ;;  %2455 = vmatprep.subr.bf16.mxu1 %v2885_v8 }
 0x55f   :  { %v1047_v55 = vpop.f32.mrb[8].mxu0  ;;  %v1118_v21 = vpop.f32.mrb[8].mxu1 }
 0x560   :  { %v1049_v23 = vpop.f32.mrb[9].mxu0  ;;  %v1120_v24 = vpop.f32.mrb[9].mxu1 }
 0x561   :  { %v1127_v28 = vcombine.low %v1047_v55, %v1049_v23  ;;  %v1128_v29 = vcombine.low %v1118_v21, %v1120_v24 }
 0x563   :  { %v1135_v30 = vrot.slane %v1127_v28, %v3017_v58  ;;  %v1142_v32 = vrot.slane %v1128_v29, %v3017_v58 }
 0x565   :  { %v1143_v33 = vcombine.low %v1135_v30, %v1142_v32 }
 0x567   :  { %v1150_v41 = vrot.slane %v1143_v33, %v3017_v58 }
 0x569   :  { %v1152_v43 = vadd.f32 %v1150_v41, %v980_v38 }
 0x56b   :  { %v1973_v45 = vmul.f32 -1.442695, %v1152_v43  ;;  %v1160_v48 = vrot.slane %v1152_v43, 1  ;;  %v1171_v50 = vrot.slane %v1152_v43, 3  ;;  %v1168_v59 = vrot.slane %v1152_v43, 2 }
 0x56d   :  { %2650 = vpow2.f32 %v1973_v45  ;;  %v1974_v49 = vmul.f32 -1.442695, %v1160_v48  ;;  %v1975_v54 = vmul.f32 -1.442695, %v1171_v50 }
 0x56e   :  { %v1194_v45 = vld [vmem:[#allocation4 + $0x5] ss:$8 sm:$0xf] }
 0x56f   :  { %2652 = vpow2.f32 %v1974_v49 }
 0x570   :  { %2654 = vpow2.f32 %v1975_v54 }
 0x577   :  { %v2651_v56 = vpop.eup %2650 }
 0x578   :  { %v1156_v60 = vadd.f32 1.0, %v2651_v56 }
 0x579   :  { %v2653_v62 = vpop.eup %2652 }
 0x57a   :  { %2656 = vrcp.f32 %v1156_v60  ;;  %v1165_v3 = vadd.f32 1.0, %v2653_v62  ;;  %v2655_v5 = vpop.eup %2654 }
 0x57b   :  { %2658 = vtanh.f32 %v1168_v59  ;;  %v1176_v12 = vadd.f32 1.0, %v2655_v5 }
 0x57c   :  { %2660 = vrcp.f32 %v1165_v3 }
 0x57d   :  { %2662 = vrcp.f32 %v1176_v12 }
 0x584   :  { %v2657_v6 = vpop.eup %2656 }
 0x585   :  { %v2659_v10 = vpop.eup %2658 }
 0x586   :  { %v2661_v11 = vpop.eup %2660  ;;  %v1180_v15 = vmul.f32 %v2659_v10, %v2657_v6 }
 0x587   :  { %v1179_v14 = vmul.f32 %v2661_v11, %v3145_v61  ;;  %v2663_v21 = vpop.eup %2662 }
 0x589   :  { %v3186_v55 = vadd.f32 %v1180_v15, %v1179_v14 }
 0x58b   :  { %2664 = vtanh.f32 %v3186_v55 }
 0x595   :  { %v2665_v23 = vpop.eup %2664 }
 0x596   :  { %v1183_v24 = vmul.f32 %v2665_v23, %v2663_v21 }
 0x598   :  { %1184 = vst [vmem:[#allocation3 + $0x4] sm:$0x1] %v1183_v24  ;;  %1260 = vmatmul.mubr.f32.vlgmr.msra.gmra.mrb[10].mxu0 %v1183_v24  ;;  %1331 = vmatmul.mubr.f32.vlgmr.msra.gmra.mrb[10].mxu1 %v1183_v24 }
 0x599   :  { %2425 = vmatpush1.bf16.msra.mxu0 %v2887_v9  ;;  %2457 = vmatpush1.bf16.msra.mxu1 %v2890_v13 }
 0x59a   :  { %2427 = vmatprep.subr.bf16.mxu0 %v2894_v17  ;;  %2459 = vmatprep.subr.bf16.mxu1 %v2896_v18 }
 0x59b   :  { %1473 = vmatprep.mubr.f32.mxu0 %v2815_v0  ;;  %1544 = vmatprep.mubr.f32.mxu1 %v2815_v0 }
 0x59d   :  { %2429 = vmatpush1.bf16.msra.mxu0 %v2899_v22  ;;  %2461 = vmatpush1.bf16.msra.mxu1 %v2903_v26 }
 0x59e   :  { %2431 = vmatprep.subr.bf16.mxu0 %v2905_v27  ;;  %2463 = vmatprep.subr.bf16.mxu1 %v2907_v31 }
 0x5a1   :  { %2433 = vmatpush1.bf16.msra.mxu0 %v2910_v35  ;;  %2465 = vmatpush1.bf16.msra.mxu1 %v2914_v39 }
 0x5a2   :  { %2435 = vmatprep.subr.bf16.mxu0 %v2916_v40  ;;  %2467 = vmatprep.subr.bf16.mxu1 %v2919_v44 }
 0x5a5   :  { %2437 = vmatpush1.bf16.msra.mxu0 %v2922_v51  ;;  %2469 = vmatpush1.bf16.msra.mxu1 %v2926_v52 }
 0x5a6   :  { %2439 = vmatprep.subr.bf16.mxu0 %v2928_v53  ;;  %2471 = vmatprep.subr.bf16.mxu1 %v2931_v57 }
 0x5a9   :  { %2441 = vmatpush1.bf16.msra.mxu0 %v2934_v63  ;;  %2473 = vmatpush1.bf16.msra.mxu1 %v2938_v1 }
 0x5aa   :  { %2443 = vmatprep.subr.bf16.mxu0 %v2940_v2  ;;  %2475 = vmatprep.subr.bf16.mxu1 %v2943_v7 }
 0x5ad   :  { %2445 = vmatpush1.bf16.msra.mxu0 %v2946_v16  ;;  %2477 = vmatpush1.bf16.msra.mxu1 %v2950_v19 }
 0x5ae   :  { %2447 = vmatprep.subr.bf16.mxu0 %v2952_v20  ;;  %2479 = vmatprep.subr.bf16.mxu1 %v2955_v25 }
 0x5b1   :  { %2449 = vmatpush1.bf16.msra.mxu0 %v2958_v34  ;;  %2481 = vmatpush1.bf16.msra.mxu1 %v2962_v36 }
 0x5b2   :  { %2451 = vmatprep.subr.bf16.mxu0 %v2964_v37  ;;  %2483 = vmatprep.subr.bf16.mxu1 %v2967_v42 }
 0x5b5   :  { %2453 = vmatpush1.bf16.msra.mxu0 %v2970_v46  ;;  %2485 = vmatpush1.bf16.msra.mxu1 %v2974_v47 }
 0x5b6   :  { %2487 = vmatprep.subr.bf16.mxu0 %v2883_v4  ;;  %2519 = vmatprep.subr.bf16.mxu1 %v2885_v8 }
 0x66b   :  { %v1261_v61 = vpop.f32.mrb[10].mxu0  ;;  %v1332_v28 = vpop.f32.mrb[10].mxu1 }
 0x66c   :  { %v1263_v29 = vpop.f32.mrb[11].mxu0  ;;  %v1334_v30 = vpop.f32.mrb[11].mxu1 }
 0x66d   :  { %v1341_v32 = vcombine.low %v1261_v61, %v1263_v29  ;;  %v1342_v33 = vcombine.low %v1332_v28, %v1334_v30 }
 0x66f   :  { %v1349_v38 = vrot.slane %v1341_v32, %v3017_v58  ;;  %v1356_v41 = vrot.slane %v1342_v33, %v3017_v58  ;;  %v1830_v32 = vld [vmem:[#allocation9] sm:$0xff]  ;;  %v1831_v33 = vld [vmem:[#allocation9 + $0x8] sm:$0xff] }
 0x671   :  { %v1357_v43 = vcombine.low %v1349_v38, %v1356_v41  ;;  %v2551_v38 = vpack.c.bf16 %v1831_v33, %v1830_v32  ;;  %v2817_v41 = vmov 0.0|0.0  }
 0x673   :  { %v1364_v48 = vrot.slane %v1357_v43, %v3017_v58  ;;  %v1832_v43 = vld [vmem:[#allocation9 + $0x10] sm:$0xff] }
 0x675   :  { %v1366_v49 = vadd.f32 %v1364_v48, %v1194_v45  ;;  %v1833_v45 = vld [vmem:[#allocation9 + $0x18] sm:$0xff] }
 0x676   :  { %v2554_v48 = vpack.c.bf16 %v1833_v45, %v1832_v43 }
 0x677   :  { %v1976_v50 = vmul.f32 -1.442695, %v1366_v49  ;;  %v1374_v54 = vrot.slane %v1366_v49, 1  ;;  %v1385_v8 = vrot.slane %v1366_v49, 3  ;;  %v1382_v60 = vrot.slane %v1366_v49, 2  ;;  %v1834_v49 = vld [vmem:[#allocation9 + $0x20] sm:$0xff] }
 0x679   :  { %2666 = vpow2.f32 %v1976_v50  ;;  %v1977_v4 = vmul.f32 -1.442695, %v1374_v54  ;;  %v1978_v56 = vmul.f32 -1.442695, %v1385_v8  ;;  %v1835_v50 = vld [vmem:[#allocation9 + $0x28] sm:$0xff]  ;;  %v1837_v8 = vld [vmem:[#allocation9 + $0x38] sm:$0xff] }
 0x67a   :  { %v2557_v54 = vpack.c.bf16 %v1835_v50, %v1834_v49 }
 0x67b   :  { %2668 = vpow2.f32 %v1977_v4  ;;  %v1836_v4 = vld [vmem:[#allocation9 + $0x30] sm:$0xff] }
 0x67c   :  { %2670 = vpow2.f32 %v1978_v56  ;;  %v2560_v56 = vpack.c.bf16 %v1837_v8, %v1836_v4 }
 0x683   :  { %v2667_v59 = vpop.eup %2666 }
 0x684   :  { %v1370_v62 = vadd.f32 1.0, %v2667_v59  ;;  %v1838_v59 = vld [vmem:[#allocation9 + $0x40] sm:$0xff] }
 0x685   :  { %v2669_v3 = vpop.eup %2668 }
 0x686   :  { %2672 = vrcp.f32 %v1370_v62  ;;  %v1379_v5 = vadd.f32 1.0, %v2669_v3  ;;  %v2671_v6 = vpop.eup %2670  ;;  %v1840_v3 = vld [vmem:[#allocation9 + $0x50] sm:$0xff] }
 0x687   :  { %2674 = vtanh.f32 %v1382_v60  ;;  %v1390_v14 = vadd.f32 1.0, %v2671_v6  ;;  %v1839_v60 = vld [vmem:[#allocation9 + $0x48] sm:$0xff] }
 0x688   :  { %2676 = vrcp.f32 %v1379_v5  ;;  %v2563_v62 = vpack.c.bf16 %v1839_v60, %v1838_v59  ;;  %v1841_v5 = vld [vmem:[#allocation9 + $0x58] sm:$0xff] }
 0x689   :  { %2678 = vrcp.f32 %v1390_v14  ;;  %v2566_v6 = vpack.c.bf16 %v1841_v5, %v1840_v3  ;;  %v1844_v14 = vld [vmem:[#allocation9 + $0x70] sm:$0xff] }
 0x690   :  { %v2673_v10 = vpop.eup %2672 }
 0x691   :  { %v2675_v11 = vpop.eup %2674 }
 0x692   :  { %v2677_v12 = vpop.eup %2676  ;;  %v1394_v21 = vmul.f32 %v2675_v11, %v2673_v10  ;;  %v1842_v10 = vld [vmem:[#allocation9 + $0x60] sm:$0xff]  ;;  %v1843_v11 = vld [vmem:[#allocation9 + $0x68] sm:$0xff] }
 0x693   :  { %v1393_v15 = vmul.f32 %v2677_v12, %v3186_v55  ;;  %v2679_v24 = vpop.eup %2678  ;;  %v2569_v12 = vpack.c.bf16 %v1843_v11, %v1842_v10 }
 0x695   :  { %v3227_v23 = vadd.f32 %v1394_v21, %v1393_v15  ;;  %v1845_v15 = vld [vmem:[#allocation9 + $0x78] sm:$0xff] }
 0x696   :  { %v2572_v21 = vpack.c.bf16 %v1845_v15, %v1844_v14 }
 0x697   :  { %2680 = vtanh.f32 %v3227_v23 }
 0x6a1   :  { %v2681_v61 = vpop.eup %2680 }
 0x6a2   :  { %v1397_v28 = vmul.f32 %v2681_v61, %v2679_v24 }
 0x6a4   :  { %1398 = vst [vmem:[#allocation3 + $0x5] sm:$0x1] %v1397_v28  ;;  %1474 = vmatmul.mubr.f32.vlgmr.msra.gmra.mrb[12].mxu0 %v1397_v28  ;;  %1545 = vmatmul.mubr.f32.vlgmr.msra.gmra.mrb[12].mxu1 %v1397_v28 }
 0x6a5   :  { %2489 = vmatpush1.bf16.msra.mxu0 %v2887_v9  ;;  %2521 = vmatpush1.bf16.msra.mxu1 %v2890_v13 }
 0x6a6   :  { %2491 = vmatprep.subr.bf16.mxu0 %v2894_v17  ;;  %2523 = vmatprep.subr.bf16.mxu1 %v2896_v18 }
 0x6a7   :  { %1687 = vmatprep.mubr.f32.mxu0 %v2815_v0  ;;  %1758 = vmatprep.mubr.f32.mxu1 %v2815_v0 }
 0x6a9   :  { %2493 = vmatpush1.bf16.msra.mxu0 %v2899_v22  ;;  %2525 = vmatpush1.bf16.msra.mxu1 %v2903_v26 }
 0x6aa   :  { %2495 = vmatprep.subr.bf16.mxu0 %v2905_v27  ;;  %2527 = vmatprep.subr.bf16.mxu1 %v2907_v31 }
 0x6ad   :  { %2497 = vmatpush1.bf16.msra.mxu0 %v2910_v35  ;;  %2529 = vmatpush1.bf16.msra.mxu1 %v2914_v39  ;;  %v1408_v39 = vld [vmem:[#allocation4 + $0x6] ss:$8 sm:$0xf] }
 0x6ae   :  { %2499 = vmatprep.subr.bf16.mxu0 %v2916_v40  ;;  %2531 = vmatprep.subr.bf16.mxu1 %v2919_v44 }
 0x6b1   :  { %2501 = vmatpush1.bf16.msra.mxu0 %v2922_v51  ;;  %2533 = vmatpush1.bf16.msra.mxu1 %v2926_v52 }
 0x6b2   :  { %2503 = vmatprep.subr.bf16.mxu0 %v2928_v53  ;;  %2535 = vmatprep.subr.bf16.mxu1 %v2931_v57 }
 0x6b5   :  { %2505 = vmatpush1.bf16.msra.mxu0 %v2934_v63  ;;  %2537 = vmatpush1.bf16.msra.mxu1 %v2938_v1 }
 0x6b6   :  { %2507 = vmatprep.subr.bf16.mxu0 %v2940_v2  ;;  %2539 = vmatprep.subr.bf16.mxu1 %v2943_v7 }
 0x6b9   :  { %2509 = vmatpush1.bf16.msra.mxu0 %v2946_v16  ;;  %2541 = vmatpush1.bf16.msra.mxu1 %v2950_v19 }
 0x6ba   :  { %2511 = vmatprep.subr.bf16.mxu0 %v2952_v20  ;;  %2543 = vmatprep.subr.bf16.mxu1 %v2955_v25 }
 0x6bd   :  { %2513 = vmatpush1.bf16.msra.mxu0 %v2958_v34  ;;  %2545 = vmatpush1.bf16.msra.mxu1 %v2962_v36 }
 0x6be   :  { %2515 = vmatprep.subr.bf16.mxu0 %v2964_v37  ;;  %2547 = vmatprep.subr.bf16.mxu1 %v2967_v42 }
 0x6c1   :  { %2517 = vmatpush1.bf16.msra.mxu0 %v2970_v46  ;;  %2549 = vmatpush1.bf16.msra.mxu1 %v2974_v47 }
 0x6c2   :  { %2550 = vmatprep.subr.bf16.mxu0 %v2817_v41 }
 0x777   :  { %v1475_v9 = vpop.f32.mrb[12].mxu0  ;;  %v1546_v13 = vpop.f32.mrb[12].mxu1 }
 0x778   :  { %v1477_v17 = vpop.f32.mrb[13].mxu0  ;;  %v1548_v18 = vpop.f32.mrb[13].mxu1 }
 0x779   :  { %v1555_v22 = vcombine.low %v1475_v9, %v1477_v17  ;;  %v1556_v26 = vcombine.low %v1546_v13, %v1548_v18 }
 0x77b   :  { %v1563_v27 = vrot.slane %v1555_v22, %v3017_v58  ;;  %v1570_v31 = vrot.slane %v1556_v26, %v3017_v58  ;;  %v1622_v26 = vld [vmem:[#allocation4 + $0x7] ss:$8 sm:$0xf] }
 0x77d   :  { %v1571_v35 = vcombine.low %v1563_v27, %v1570_v31 }
 0x77f   :  { %v1578_v40 = vrot.slane %v1571_v35, %v3017_v58 }
 0x781   :  { %v1580_v44 = vadd.f32 %v1578_v40, %v1408_v39 }
 0x783   :  { %v1979_v51 = vmul.f32 -1.442695, %v1580_v44  ;;  %v1588_v52 = vrot.slane %v1580_v44, 1  ;;  %v1599_v57 = vrot.slane %v1580_v44, 3  ;;  %v1596_v2 = vrot.slane %v1580_v44, 2 }
 0x785   :  { %2682 = vpow2.f32 %v1979_v51  ;;  %v1980_v53 = vmul.f32 -1.442695, %v1588_v52  ;;  %v1981_v63 = vmul.f32 -1.442695, %v1599_v57 }
 0x787   :  { %2684 = vpow2.f32 %v1980_v53 }
 0x788   :  { %2686 = vpow2.f32 %v1981_v63 }
 0x78f   :  { %v2683_v1 = vpop.eup %2682 }
 0x790   :  { %v1584_v7 = vadd.f32 1.0, %v2683_v1 }
 0x791   :  { %v2685_v16 = vpop.eup %2684 }
 0x792   :  { %2688 = vrcp.f32 %v1584_v7  ;;  %v1593_v19 = vadd.f32 1.0, %v2685_v16  ;;  %v2687_v20 = vpop.eup %2686 }
 0x793   :  { %2690 = vtanh.f32 %v1596_v2  ;;  %v1604_v37 = vadd.f32 1.0, %v2687_v20 }
 0x794   :  { %2692 = vrcp.f32 %v1593_v19 }
 0x795   :  { %2694 = vrcp.f32 %v1604_v37 }
 0x79c   :  { %v2689_v25 = vpop.eup %2688 }
 0x79d   :  { %v2691_v34 = vpop.eup %2690 }
 0x79e   :  { %v2693_v36 = vpop.eup %2692  ;;  %v1608_v46 = vmul.f32 %v2691_v34, %v2689_v25 }
 0x79f   :  { %v1607_v42 = vmul.f32 %v2693_v36, %v3227_v23  ;;  %v2695_v55 = vpop.eup %2694 }
 0x7a1   :  { %v3266_v47 = vadd.f32 %v1608_v46, %v1607_v42  ;;  %v1985_v46 = vld [vmem:[%s3292_s3] ss:$0 sm:$0xff] }
 0x7a3   :  { %2696 = vtanh.f32 %v3266_v47 }
 0x7ad   :  { %v2697_v29 = vpop.eup %2696 }
 0x7ae   :  { %v1611_v30 = vmul.f32 %v2697_v29, %v2695_v55 }
 0x7b0   :  { %1612 = vst [vmem:[#allocation3 + $0x6] sm:$0x1] %v1611_v30  ;;  %1688 = vmatmul.mubr.f32.vlgmr.msra.gmra.mrb[14].mxu0 %v1611_v30  ;;  %1759 = vmatmul.mubr.f32.vlgmr.msra.gmra.mrb[14].mxu1 %v1611_v30 }
 0x7b1   :  { %2552 = vmatpush3.bf16.msra.mxu0 %v2551_v38  ;;  %2035 = vmatprep.mubr.msk.f32.mxu0 %vm2818_vm0, %v2815_v0 }
 0x7b2   :  { %2553 = vmatprep.subr.bf16.mxu0 %v2817_v41 }
 0x7b5   :  { %2555 = vmatpush3.bf16.msra.mxu0 %v2554_v48 }
 0x7b6   :  { %2556 = vmatprep.subr.bf16.mxu0 %v2817_v41 }
 0x7b9   :  { %2558 = vmatpush3.bf16.msra.mxu0 %v2557_v54 }
 0x7ba   :  { %2559 = vmatprep.subr.bf16.mxu0 %v2817_v41 }
 0x7bd   :  { %2561 = vmatpush3.bf16.msra.mxu0 %v2560_v56 }
 0x7be   :  { %2562 = vmatprep.subr.bf16.mxu0 %v2817_v41 }
 0x7c1   :  { %2564 = vmatpush3.bf16.msra.mxu0 %v2563_v62 }
 0x7c2   :  { %2565 = vmatprep.subr.bf16.mxu0 %v2817_v41 }
 0x7c5   :  { %2567 = vmatpush3.bf16.msra.mxu0 %v2566_v6 }
 0x7c6   :  { %2568 = vmatprep.subr.bf16.mxu0 %v2817_v41 }
 0x7c9   :  { %2570 = vmatpush3.bf16.msra.mxu0 %v2569_v12 }
 0x7ca   :  { %2571 = vmatprep.subr.bf16.mxu0 %v2817_v41 }
 0x7cd   :  { %2573 = vmatpush3.bf16.msra.mxu0 %v2572_v21 }
 0x883   :  { %v1689_v23 = vpop.f32.mrb[14].mxu0  ;;  %v1760_v24 = vpop.f32.mrb[14].mxu1 }
 0x884   :  { %v1691_v61 = vpop.f32.mrb[15].mxu0  ;;  %v1762_v28 = vpop.f32.mrb[15].mxu1 }
 0x885   :  { %v1769_v9 = vcombine.low %v1689_v23, %v1691_v61  ;;  %v1770_v13 = vcombine.low %v1760_v24, %v1762_v28 }
 0x887   :  { %v1777_v17 = vrot.slane %v1769_v9, %v3017_v58  ;;  %v1784_v18 = vrot.slane %v1770_v13, %v3017_v58 }
 0x889   :  { %v1785_v22 = vcombine.low %v1777_v17, %v1784_v18 }
 0x88b   :  { %v1792_v27 = vrot.slane %v1785_v22, %v3017_v58 }
 0x88d   :  { %v1794_v31 = vadd.f32 %v1792_v27, %v1622_v26 }
 0x88f   :  { %v1982_v0 = vmul.f32 -1.442695, %v1794_v31  ;;  %v1802_v35 = vrot.slane %v1794_v31, 1  ;;  %v1813_v40 = vrot.slane %v1794_v31, 3  ;;  %v1810_v52 = vrot.slane %v1794_v31, 2 }
 0x891   :  { %2698 = vpow2.f32 %v1982_v0  ;;  %v1983_v39 = vmul.f32 -1.442695, %v1802_v35  ;;  %v1984_v44 = vmul.f32 -1.442695, %v1813_v40 }
 0x893   :  { %2700 = vpow2.f32 %v1983_v39 }
 0x894   :  { %2702 = vpow2.f32 %v1984_v44 }
 0x89b   :  { %v2699_v51 = vpop.eup %2698 }
 0x89c   :  { %v1798_v53 = vadd.f32 1.0, %v2699_v51 }
 0x89d   :  { %v2701_v57 = vpop.eup %2700 }
 0x89e   :  { %2704 = vrcp.f32 %v1798_v53  ;;  %v1807_v63 = vadd.f32 1.0, %v2701_v57  ;;  %v2703_v1 = vpop.eup %2702 }
 0x89f   :  { %2706 = vtanh.f32 %v1810_v52  ;;  %v1818_v16 = vadd.f32 1.0, %v2703_v1 }
 0x8a0   :  { %2708 = vrcp.f32 %v1807_v63 }
 0x8a1   :  { %2710 = vrcp.f32 %v1818_v16 }
 0x8a8   :  { %v2705_v2 = vpop.eup %2704 }
 0x8a9   :  { %v2707_v58 = vpop.eup %2706 }
 0x8aa   :  { %v2709_v7 = vpop.eup %2708  ;;  %v1822_v20 = vmul.f32 %v2707_v58, %v2705_v2 }
 0x8ab   :  { %v1821_v19 = vmul.f32 %v2709_v7, %v3266_v47  ;;  %v2711_v34 = vpop.eup %2710 }
 0x8ad   :  { %v1823_v25 = vadd.f32 %v1822_v20, %v1821_v19 }
 0x8af   :  { %2712 = vtanh.f32 %v1823_v25 }
 0x8b9   :  { %v2713_v36 = vpop.eup %2712 }
 0x8ba   :  { %v1825_v37 = vmul.f32 %v2713_v36, %v2711_v34 }
 0x8bc   :  { %1826 = vst [vmem:[#allocation3 + $0x7] sm:$0x1] %v1825_v37 }
 0x8c3   :  { %v1827_v42 = vld [vmem:[#allocation3] sm:$0xff] }
 0x8c4   :  { %2036 = vmatmul.mubr.f32.vlgmr.msra.gmra.mrb[16].mxu0 %v1827_v42 }
 0x997   :  { %v1919_v55 = vpop.f32.mrb[16].mxu0 }
 0x998   :  { %v1920_v29 = vadd.f32 %v1985_v46, %v1919_v55  ;;  %v2037_v30 = vpop.f32.mrb[17].mxu0 }
 0x99a   :  { %1923 = vst [vmem:[#allocation10] sm:$0xff] %v1920_v29 }
 0x99b   :  { %2791 = shalt.err (!%p2788_p0)
}
 0x99c   :  { %s2792_s7 = scalar_lea.hbm %s3293_s4, 128 }
 0x99d   :  { %p2793_p1 = scmp.ne.s32.totalorder %s3293_s4, %s2792_s7  ;;  %p2796_p2 = scmp.lt.u32.totalorder %s2792_s7, %s3293_s4 }
 0x99f   :  { %p2798_p3 = pnand %p2796_p2, %p2793_p1 }
 0x9a1   :  { %2801 = shalt.err (!%p2798_p3)
}
 0x9a2   :  { %1933 = dma.vmem_to_hbm [thread:$0]  %s1931_s29, 128, %s3293_s4, [#allocation6]  }
 0x9a3   :  { %2806 = dma.done.wait [#allocation6], 128  }
 0x9a4   :  { %2807 = vsyncadd [#allocation6], 4294967168 }
 0x9a5   :  { %1937 = vsyncpa [#allocation5], 1 }
 0x9a6   :  { %1938 = vsyncpa [#allocation8], 1 }
 0x9a7   :  { %1939 = vsyncpa [#allocation6], 1 }

</bundles_post_ra>
